<compile_context>
chip_gen: v5e
topology: v5e:2x2
jax: 0.10.0
libtpu: 0.0.40
codegen_flags: <defaults>
</compile_context>

<pallas_src>
import functools

import jax
import jax.numpy as jnp
from jax.experimental import pallas as pl
from jax.experimental.pallas import tpu as pltpu

PAD_IDX = 0          # token2idx['<PAD>']
_BB = 8              # batch rows per block (f32 sublane count)
_LANE = 128          # lane width
_NEG_BIG = -1e30     # bias for padded tag lanes (excluded from softmax)


def _rup(x, m):
    return ((x + m - 1) // m) * m


def _lstm_tagger_kernel(len_ref, emb_ref, wih_ref, whh_ref, b_ref,
                        wfc_ref, bfc_ref, out_ref,
                        h_scr, c_scr, gbuf, hbuf):
    """One (batch_block, time_block) grid step.

    len_ref : (1, BB, 1)      int32 sentence lengths for this batch block
    emb_ref : (TC, BB, Ep)    embedded tokens (time-major chunk)
    wih_ref : (Ep, 4*Hp)      LSTM input weights, transposed, gate order i,f,g,o
    whh_ref : (Hp, 4*Hp)      LSTM hidden weights, transposed
    b_ref   : (1, 4*Hp)       bias_ih + bias_hh (gate-padded)
    wfc_ref : (Hp, TAGp)      FC weight, transposed
    bfc_ref : (1, TAGp)       FC bias (-1e30 in padded tag lanes)
    out_ref : (TC, BB, TAGp)  log-softmax tag scores for this chunk
    h_scr/c_scr : (BB, Hp)    recurrent state, persists across time blocks
    gbuf    : (TC, BB, 4*Hp)  precomputed input projection for the chunk
    hbuf    : (TC, BB, Hp)    per-step hidden outputs for the chunk
    """
    TC, BB, Ep = emb_ref.shape
    Hp = h_scr.shape[1]
    tb = pl.program_id(1)

    @pl.when(tb == 0)
    def _():
        h_scr[...] = jnp.zeros_like(h_scr)
        c_scr[...] = jnp.zeros_like(c_scr)

    # ---- (1) Input projection for the whole chunk: one MXU-shaped matmul. ----
    x = emb_ref[...].reshape(TC * BB, Ep)
    gx = jnp.dot(x, wih_ref[...], preferred_element_type=jnp.float32) + b_ref[...]
    gbuf[...] = gx.reshape(TC, BB, 4 * Hp)

    # ---- (2) Serial recurrence: only h @ W_hh + gate elementwise remain. ----
    def one_step(t, carry):
        h, c = carry
        g = gbuf[t] + jnp.dot(h, whh_ref[...], preferred_element_type=jnp.float32)
        i_g = jax.nn.sigmoid(g[:, 0 * Hp:1 * Hp])
        f_g = jax.nn.sigmoid(g[:, 1 * Hp:2 * Hp])
        g_g = jnp.tanh(g[:, 2 * Hp:3 * Hp])
        o_g = jax.nn.sigmoid(g[:, 3 * Hp:4 * Hp])
        c_new = f_g * c + i_g * g_g
        h_new = o_g * jnp.tanh(c_new)
        hbuf[t] = h_new
        return h_new, c_new

    def two_steps(i, carry):          # manual 2x unroll (TC is forced even)
        carry = one_step(2 * i, carry)
        return one_step(2 * i + 1, carry)

    h_fin, c_fin = jax.lax.fori_loop(0, TC // 2, two_steps,
                                     (h_scr[...], c_scr[...]))
    h_scr[...] = h_fin
    c_scr[...] = c_fin

    # ---- (3) pack/pad_packed mask + FC + log-softmax, once per chunk. ----
    t0 = tb * TC
    t_idx = jax.lax.broadcasted_iota(jnp.int32, (TC, BB, 1), 0) + t0
    mask = (t_idx < len_ref[...]).astype(jnp.float32)            # (TC, BB, 1)
    hm = (hbuf[...] * mask).reshape(TC * BB, Hp)
    logits = (jnp.dot(hm, wfc_ref[...], preferred_element_type=jnp.float32)
              + bfc_ref[...])                                    # (TC*BB, TAGp)
    mx = jnp.max(logits, axis=-1, keepdims=True)
    lse = jnp.log(jnp.sum(jnp.exp(logits - mx), axis=-1, keepdims=True)) + mx
    out_ref[...] = (logits - lse).reshape(TC, BB, logits.shape[-1])


def _prep_kernel_params(params):
    """Pad / transpose PyTorch-layout parameters into the kernel layout."""
    emb = params["embedding"]                 # (V, E)
    w_ih = params["w_ih"]                     # (4H, E), gates i,f,g,o
    w_hh = params["w_hh"]                     # (4H, H)
    b_all = params["b_ih"] + params["b_hh"]   # (4H,)
    w_fc = params["w_fc"]                     # (TAG, H)
    b_fc = params["b_fc"]                     # (TAG,)

    V, E = emb.shape
    H = w_hh.shape[1]
    TAG = w_fc.shape[0]
    Ep, Hp, TAGp = _rup(E, _LANE), _rup(H, _LANE), _rup(TAG, _LANE)

    emb_p = jnp.zeros((V, Ep), jnp.float32).at[:, :E].set(emb)

    def gate_pad(w_t, rows_p):
        # (rows, 4H) -> (rows_p, 4Hp); each gate goes to its own Hp-wide,
        # lane-tile-aligned column slot; padded rows/cols stay zero so the
        # padded hidden units remain exactly zero through the recurrence.
        rows = w_t.shape[0]
        out = jnp.zeros((rows_p, 4 * Hp), jnp.float32)
        for g in range(4):
            out = out.at[:rows, g * Hp:g * Hp + H].set(w_t[:, g * H:(g + 1) * H])
        return out

    wih_t = gate_pad(w_ih.T.astype(jnp.float32), Ep)             # (Ep, 4Hp)
    whh_t = gate_pad(w_hh.T.astype(jnp.float32), Hp)             # (Hp, 4Hp)
    b_p = gate_pad(b_all.astype(jnp.float32)[None, :], 1)        # (1, 4Hp)
    wfc_t = jnp.zeros((Hp, TAGp), jnp.float32).at[:H, :TAG].set(w_fc.T)
    bfc_p = jnp.full((1, TAGp), _NEG_BIG, jnp.float32).at[0, :TAG].set(b_fc)

    return dict(emb=emb_p, wih_t=wih_t, whh_t=whh_t, b=b_p,
                wfc_t=wfc_t, bfc=bfc_p, dims=(E, H, TAG, Ep, Hp, TAGp))


@functools.partial(jax.jit, static_argnames=("time_chunk",))
def rnn_tagger_forward(padded_sentences, params, *, time_chunk=None):
    """Forward pass of RNNTagger.

    padded_sentences: (B, T) int32 token ids, trailing padding = PAD_IDX.
    Returns (B, T, TAGSET) float32 log-softmax tag scores (batch-first, like
    the PyTorch module).
    """
    kp = _prep_kernel_params(params)
    _, _, TAG, Ep, Hp, TAGp = kp["dims"]

    B, T = padded_sentences.shape
    if time_chunk is None:
        TC = min(_rup(T, 2), 32)          # even time chunk, streamed over a grid
    else:
        TC = max(2, _rup(int(time_chunk), 2))
    Bp, Tp = _rup(B, _BB), _rup(T, TC)
    NB, NT = Bp // _BB, Tp // TC

    toks = padded_sentences.astype(jnp.int32)
    lengths = jnp.sum(toks != PAD_IDX, axis=1).astype(jnp.int32)            # (B,)
    len_p = jnp.zeros((Bp,), jnp.int32).at[:B].set(lengths).reshape(NB, _BB, 1)

    tok_p = jnp.full((Bp, Tp), PAD_IDX, jnp.int32).at[:B, :T].set(toks)
    # Gather embeddings directly time-major: no transpose pass over (T,B,E).
    # TODO(synk): move this row gather in-kernel (scalar-prefetched ids +
    # manual DMA) to avoid materializing (Tp, Bp, Ep) in HBM.
    emb_tm = kp["emb"][tok_p.T]                                             # (Tp, Bp, Ep)

    grid_spec = pltpu.PrefetchScalarGridSpec(
        num_scalar_prefetch=0,
        grid=(NB, NT),
        in_specs=[
            pl.BlockSpec((1, _BB, 1), lambda b, t: (b, 0, 0)),      # lengths
            pl.BlockSpec((TC, _BB, Ep), lambda b, t: (t, b, 0)),    # emb chunk
            pl.BlockSpec((Ep, 4 * Hp), lambda b, t: (0, 0)),        # W_ih^T
            pl.BlockSpec((Hp, 4 * Hp), lambda b, t: (0, 0)),        # W_hh^T
            pl.BlockSpec((1, 4 * Hp), lambda b, t: (0, 0)),         # bias
            pl.BlockSpec((Hp, TAGp), lambda b, t: (0, 0)),          # W_fc^T
            pl.BlockSpec((1, TAGp), lambda b, t: (0, 0)),           # b_fc
        ],
        out_specs=pl.BlockSpec((TC, _BB, TAGp), lambda b, t: (t, b, 0)),
        scratch_shapes=[
            pltpu.VMEM((_BB, Hp), jnp.float32),           # h (persists over t)
            pltpu.VMEM((_BB, Hp), jnp.float32),           # c (persists over t)
            pltpu.VMEM((TC, _BB, 4 * Hp), jnp.float32),   # input-proj chunk
            pltpu.VMEM((TC, _BB, Hp), jnp.float32),       # hidden-output chunk
        ],
    )

    out_tm = pl.pallas_call(
        _lstm_tagger_kernel,
        out_shape=jax.ShapeDtypeStruct((Tp, Bp, TAGp), jnp.float32),
        grid_spec=grid_spec,
        compiler_params=pltpu.CompilerParams(
            dimension_semantics=("parallel", "arbitrary"),
            vmem_limit_bytes=32 * 1024 * 1024,
        ),
    )(len_p, emb_tm, kp["wih_t"], kp["whh_t"], kp["b"], kp["wfc_t"], kp["bfc"])

    # Slice padding first (fewer bytes), then return batch-first like PyTorch.
    return jnp.transpose(out_tm[:T, :B, :TAG], (1, 0, 2))


def rnn_tagger_reference(padded_sentences, params):
    """Pure-JAX reference reproducing the PyTorch RNNTagger forward."""
    emb = params["embedding"][padded_sentences]                   # (B, T, E)
    lengths = jnp.sum(padded_sentences != PAD_IDX, axis=1)
    B, T = padded_sentences.shape
    H = params["w_hh"].shape[1]
    w_ih, w_hh = params["w_ih"], params["w_hh"]
    b = params["b_ih"] + params["b_hh"]

    def cell(carry, x_t):
        h, c = carry
        g = x_t @ w_ih.T + h @ w_hh.T + b
        i = jax.nn.sigmoid(g[:, 0 * H:1 * H])
        f = jax.nn.sigmoid(g[:, 1 * H:2 * H])
        gg = jnp.tanh(g[:, 2 * H:3 * H])
        o = jax.nn.sigmoid(g[:, 3 * H:4 * H])
        c = f * c + i * gg
        h = o * jnp.tanh(c)
        return (h, c), h

    init = (jnp.zeros((B, H), jnp.float32), jnp.zeros((B, H), jnp.float32))
    _, hs = jax.lax.scan(cell, init, jnp.transpose(emb, (1, 0, 2)))
    hs = jnp.transpose(hs, (1, 0, 2))                             # (B, T, H)
    mask = (jnp.arange(T)[None, :] < lengths[:, None]).astype(jnp.float32)
    hs = hs * mask[:, :, None]                                    # pad_packed zeros
    logits = hs @ params["w_fc"].T + params["b_fc"]
    return jax.nn.log_softmax(logits, axis=-1)


def init_params(key, vocab_size, emb_dim, hidden_dim, tagset_size):
    """Deterministic synthetic parameters in PyTorch layout."""
    k = jax.random.split(key, 7)
    bound = 1.0 / jnp.sqrt(hidden_dim)
    embedding = jax.random.normal(k[0], (vocab_size, emb_dim), jnp.float32)
    embedding = embedding.at[PAD_IDX].set(0.0)          # padding_idx -> zeros
    w_ih = jax.random.uniform(k[1], (4 * hidden_dim, emb_dim), jnp.float32, -bound, bound)
    w_hh = jax.random.uniform(k[2], (4 * hidden_dim, hidden_dim), jnp.float32, -bound, bound)
    b_ih = jax.random.uniform(k[3], (4 * hidden_dim,), jnp.float32, -bound, bound)
    b_hh = jax.random.uniform(k[4], (4 * hidden_dim,), jnp.float32, -bound, bound)
    w_fc = jax.random.uniform(k[5], (tagset_size, hidden_dim), jnp.float32, -bound, bound)
    b_fc = jax.random.uniform(k[6], (tagset_size,), jnp.float32, -bound, bound)
    return {"embedding": embedding, "w_ih": w_ih, "w_hh": w_hh,
            "b_ih": b_ih, "b_hh": b_hh, "w_fc": w_fc, "b_fc": b_fc}


if __name__ == "__main__":
    # Small shapes consistent with the module.
    B, T = 2, 8
    VOCAB, EMB, HID, TAGS = 20, 16, 32, 8

    key = jax.random.PRNGKey(0)
    pkey, dkey = jax.random.split(key)
    params = init_params(pkey, VOCAB, EMB, HID, TAGS)

    # Padded sentences: tokens in [1, VOCAB), trailing PAD; one sentence has
    # full length T (matches the view() assumption in the PyTorch forward).
    tokens = jax.random.randint(dkey, (B, T), 1, VOCAB, dtype=jnp.int32)
    lengths = jnp.array([T, 5], dtype=jnp.int32)
    t_idx = jnp.arange(T)[None, :]
    padded_sentences = jnp.where(t_idx < lengths[:, None], tokens, PAD_IDX)

    tag_scores = rnn_tagger_forward(padded_sentences, params)
    jax.block_until_ready(tag_scores)

    assert tag_scores.shape == (B, T, TAGS)
    assert bool(jnp.all(jnp.isfinite(tag_scores)))

    ref = rnn_tagger_reference(padded_sentences, params)
    max_err = float(jnp.max(jnp.abs(tag_scores - ref)))
    assert max_err < 2e-3, f"mismatch vs pure-JAX reference: {max_err}"

    print("KERNEL_OK")
</pallas_src>

<mosaic_0001>
module attributes {stable_mosaic.version = 11 : i64} {
  func.func @_lstm_tagger_kernel(%arg0: i32, %arg1: i32, %arg2: memref<1x8x1xi32, #tpu.memory_space<vmem>>, %arg3: memref<8x8x128xf32, #tpu.memory_space<vmem>>, %arg4: memref<128x512xf32, #tpu.memory_space<vmem>>, %arg5: memref<128x512xf32, #tpu.memory_space<vmem>>, %arg6: memref<1x512xf32, #tpu.memory_space<vmem>>, %arg7: memref<128x128xf32, #tpu.memory_space<vmem>>, %arg8: memref<1x128xf32, #tpu.memory_space<vmem>>, %arg9: memref<8x8x128xf32, #tpu.memory_space<vmem>>, %arg10: memref<8x128xf32, #tpu.memory_space<vmem>>, %arg11: memref<8x128xf32, #tpu.memory_space<vmem>>, %arg12: memref<8x8x512xf32, #tpu.memory_space<vmem>>, %arg13: memref<8x8x128xf32, #tpu.memory_space<vmem>>) attributes {dimension_semantics = [#tpu.dimension_semantics<parallel>, #tpu.dimension_semantics<arbitrary>], iteration_bounds = array<i64: 1, 1>, scalar_prefetch = 0 : i64, scratch_operands = 4 : i64, tpu.core_type = #tpu.core_type<tc>, window_params = [{transform_indices = @transform_0, window_bounds = array<i64: 1, 8, 1>}, {transform_indices = @transform_1, window_bounds = array<i64: 8, 8, 128>}, {pipeline_mode = #tpu.pipeline_mode<synchronous>, transform_indices = @transform_2, window_bounds = array<i64: 128, 512>}, {pipeline_mode = #tpu.pipeline_mode<synchronous>, transform_indices = @transform_3, window_bounds = array<i64: 128, 512>}, {pipeline_mode = #tpu.pipeline_mode<synchronous>, transform_indices = @transform_4, window_bounds = array<i64: 1, 512>}, {pipeline_mode = #tpu.pipeline_mode<synchronous>, transform_indices = @transform_5, window_bounds = array<i64: 128, 128>}, {pipeline_mode = #tpu.pipeline_mode<synchronous>, transform_indices = @transform_6, window_bounds = array<i64: 1, 128>}, {transform_indices = @transform_7, window_bounds = array<i64: 8, 8, 128>}]} {
    %c0_i32 = arith.constant 0 : i32
    %0 = arith.cmpi eq, %arg1, %c0_i32 : i32
    %1 = arith.extui %0 : i1 to i32
    %c0_i32_0 = arith.constant 0 : i32
    %2 = arith.cmpi ne, %1, %c0_i32_0 : i32
    scf.if %2 {
      %cst_36 = arith.constant 0.000000e+00 : f32
      %49 = vector.broadcast %cst_36 : f32 to vector<8x128xf32>
      %c0_37 = arith.constant 0 : index
      %c0_38 = arith.constant 0 : index
      %50 = vector.load %arg10[%c0_37, %c0_38] : memref<8x128xf32, #tpu.memory_space<vmem>>, vector<8x128xf32>
      tpu.vector_store %arg10[%c0_37, %c0_38], %49 {strides = array<i32>} : memref<8x128xf32, #tpu.memory_space<vmem>>, vector<8x128xf32>,
      %cst_39 = arith.constant 0.000000e+00 : f32
      %51 = vector.broadcast %cst_39 : f32 to vector<8x128xf32>
      %c0_40 = arith.constant 0 : index
      %c0_41 = arith.constant 0 : index
      %52 = vector.load %arg11[%c0_40, %c0_41] : memref<8x128xf32, #tpu.memory_space<vmem>>, vector<8x128xf32>
      tpu.vector_store %arg11[%c0_40, %c0_41], %51 {strides = array<i32>} : memref<8x128xf32, #tpu.memory_space<vmem>>, vector<8x128xf32>,
    } else {
    }
    %c0 = arith.constant 0 : index
    %c0_1 = arith.constant 0 : index
    %c0_2 = arith.constant 0 : index
    %3 = vector.load %arg3[%c0, %c0_1, %c0_2] : memref<8x8x128xf32, #tpu.memory_space<vmem>>, vector<8x8x128xf32>
    %4 = vector.shape_cast %3 : vector<8x8x128xf32> to vector<64x128xf32>
    %c0_3 = arith.constant 0 : index
    %c0_4 = arith.constant 0 : index
    %5 = vector.load %arg4[%c0_3, %c0_4] : memref<128x512xf32, #tpu.memory_space<vmem>>, vector<128x512xf32>
    %cst = arith.constant dense<0.000000e+00> : vector<64x512xf32>
    %6 = tpu.matmul %4, %5, %cst {dimension_numbers = #tpu.dot_dimension_numbers<[1], [0], [0], [1], [0, 0, 1, 1], [], []>} : vector<64x128xf32>, vector<128x512xf32>, vector<64x512xf32> -> vector<64x512xf32>
    %c0_5 = arith.constant 0 : index
    %c0_6 = arith.constant 0 : index
    %7 = vector.load %arg6[%c0_5, %c0_6] : memref<1x512xf32, #tpu.memory_space<vmem>>, vector<1x512xf32>
    %8 = vector.broadcast %7 : vector<1x512xf32> to vector<64x512xf32>
    %9 = arith.addf %6, %8 : vector<64x512xf32>
    %10 = vector.shape_cast %9 : vector<64x512xf32> to vector<8x8x512xf32>
    %c0_7 = arith.constant 0 : index
    %c0_8 = arith.constant 0 : index
    %c0_9 = arith.constant 0 : index
    %11 = vector.load %arg12[%c0_7, %c0_8, %c0_9] : memref<8x8x512xf32, #tpu.memory_space<vmem>>, vector<8x8x512xf32>
    tpu.vector_store %arg12[%c0_7, %c0_8, %c0_9], %10 {strides = array<i32>} : memref<8x8x512xf32, #tpu.memory_space<vmem>>, vector<8x8x512xf32>,
    %c0_10 = arith.constant 0 : index
    %c0_11 = arith.constant 0 : index
    %12 = vector.load %arg10[%c0_10, %c0_11] : memref<8x128xf32, #tpu.memory_space<vmem>>, vector<8x128xf32>
    %c0_12 = arith.constant 0 : index
    %c0_13 = arith.constant 0 : index
    %13 = vector.load %arg11[%c0_12, %c0_13] : memref<8x128xf32, #tpu.memory_space<vmem>>, vector<8x128xf32>
    %c0_i32_14 = arith.constant 0 : i32
    %c4_i32 = arith.constant 4 : i32
    %14 = arith.addi %c0_i32_14, %c4_i32 : i32
    %c1_i32 = arith.constant 1 : i32
    %15:2 = scf.for %arg14 = %c0_i32_14 to %14 step %c1_i32 iter_args(%arg15 = %12, %arg16 = %13) -> (vector<8x128xf32>, vector<8x128xf32>)  : i32 {
      %c2_i32 = arith.constant 2 : i32
      %49 = arith.muli %c2_i32, %arg14 : i32
      %50 = arith.index_cast %49 : i32 to index
      %c0_36 = arith.constant 0 : index
      %c0_37 = arith.constant 0 : index
      %51 = vector.load %arg12[%50, %c0_36, %c0_37] : memref<8x8x512xf32, #tpu.memory_space<vmem>>, vector<1x8x512xf32>
      %52 = vector.shape_cast %51 : vector<1x8x512xf32> to vector<8x512xf32>
      %c0_38 = arith.constant 0 : index
      %c0_39 = arith.constant 0 : index
      %53 = vector.load %arg5[%c0_38, %c0_39] : memref<128x512xf32, #tpu.memory_space<vmem>>, vector<128x512xf32>
      %cst_40 = arith.constant dense<0.000000e+00> : vector<8x512xf32>
      %54 = tpu.matmul %arg15, %53, %cst_40 {dimension_numbers = #tpu.dot_dimension_numbers<[1], [0], [0], [1], [0, 0, 1, 1], [], []>} : vector<8x128xf32>, vector<128x512xf32>, vector<8x512xf32> -> vector<8x512xf32>
      %55 = arith.addf %52, %54 : vector<8x512xf32>
      %56 = vector.extract_strided_slice %55 {offsets = [0, 0], sizes = [8, 128], strides = [1, 1]} : vector<8x512xf32> to vector<8x128xf32>
      %57 = arith.negf %56 : vector<8x128xf32>
      %58 = math.exp %57 : vector<8x128xf32>
      %cst_41 = arith.constant 1.000000e+00 : f32
      %59 = vector.broadcast %cst_41 : f32 to vector<8x128xf32>
      %60 = arith.addf %59, %58 : vector<8x128xf32>
      %61 = arith.divf %59, %60 : vector<8x128xf32>
      %62 = vector.extract_strided_slice %55 {offsets = [0, 128], sizes = [8, 128], strides = [1, 1]} : vector<8x512xf32> to vector<8x128xf32>
      %63 = arith.negf %62 : vector<8x128xf32>
      %64 = math.exp %63 : vector<8x128xf32>
      %cst_42 = arith.constant 1.000000e+00 : f32
      %65 = vector.broadcast %cst_42 : f32 to vector<8x128xf32>
      %66 = arith.addf %65, %64 : vector<8x128xf32>
      %67 = arith.divf %65, %66 : vector<8x128xf32>
      %68 = vector.extract_strided_slice %55 {offsets = [0, 256], sizes = [8, 128], strides = [1, 1]} : vector<8x512xf32> to vector<8x128xf32>
      %69 = math.tanh %68 : vector<8x128xf32>
      %70 = vector.extract_strided_slice %55 {offsets = [0, 384], sizes = [8, 128], strides = [1, 1]} : vector<8x512xf32> to vector<8x128xf32>
      %71 = arith.negf %70 : vector<8x128xf32>
      %72 = math.exp %71 : vector<8x128xf32>
      %cst_43 = arith.constant 1.000000e+00 : f32
      %73 = vector.broadcast %cst_43 : f32 to vector<8x128xf32>
      %74 = arith.addf %73, %72 : vector<8x128xf32>
      %75 = arith.divf %73, %74 : vector<8x128xf32>
      %76 = arith.mulf %67, %arg16 : vector<8x128xf32>
      %77 = arith.mulf %61, %69 : vector<8x128xf32>
      %78 = arith.addf %76, %77 : vector<8x128xf32>
      %79 = math.tanh %78 : vector<8x128xf32>
      %80 = arith.mulf %75, %79 : vector<8x128xf32>
      %81 = arith.index_cast %49 : i32 to index
      %c0_44 = arith.constant 0 : index
      %c0_45 = arith.constant 0 : index
      %82 = vector.load %arg13[%81, %c0_44, %c0_45] : memref<8x8x128xf32, #tpu.memory_space<vmem>>, vector<1x8x128xf32>
      %83 = vector.shape_cast %82 : vector<1x8x128xf32> to vector<8x128xf32>
      %84 = vector.shape_cast %80 : vector<8x128xf32> to vector<1x8x128xf32>
      tpu.vector_store %arg13[%81, %c0_44, %c0_45], %84 {strides = array<i32>} : memref<8x8x128xf32, #tpu.memory_space<vmem>>, vector<1x8x128xf32>,
      %c2_i32_46 = arith.constant 2 : i32
      %85 = arith.muli %c2_i32_46, %arg14 : i32
      %c1_i32_47 = arith.constant 1 : i32
      %86 = arith.addi %85, %c1_i32_47 : i32
      %87 = arith.index_cast %86 : i32 to index
      %c0_48 = arith.constant 0 : index
      %c0_49 = arith.constant 0 : index
      %88 = vector.load %arg12[%87, %c0_48, %c0_49] : memref<8x8x512xf32, #tpu.memory_space<vmem>>, vector<1x8x512xf32>
      %89 = vector.shape_cast %88 : vector<1x8x512xf32> to vector<8x512xf32>
      %c0_50 = arith.constant 0 : index
      %c0_51 = arith.constant 0 : index
      %90 = vector.load %arg5[%c0_50, %c0_51] : memref<128x512xf32, #tpu.memory_space<vmem>>, vector<128x512xf32>
      %cst_52 = arith.constant dense<0.000000e+00> : vector<8x512xf32>
      %91 = tpu.matmul %80, %90, %cst_52 {dimension_numbers = #tpu.dot_dimension_numbers<[1], [0], [0], [1], [0, 0, 1, 1], [], []>} : vector<8x128xf32>, vector<128x512xf32>, vector<8x512xf32> -> vector<8x512xf32>
      %92 = arith.addf %89, %91 : vector<8x512xf32>
      %93 = vector.extract_strided_slice %92 {offsets = [0, 0], sizes = [8, 128], strides = [1, 1]} : vector<8x512xf32> to vector<8x128xf32>
      %94 = arith.negf %93 : vector<8x128xf32>
      %95 = math.exp %94 : vector<8x128xf32>
      %cst_53 = arith.constant 1.000000e+00 : f32
      %96 = vector.broadcast %cst_53 : f32 to vector<8x128xf32>
      %97 = arith.addf %96, %95 : vector<8x128xf32>
      %98 = arith.divf %96, %97 : vector<8x128xf32>
      %99 = vector.extract_strided_slice %92 {offsets = [0, 128], sizes = [8, 128], strides = [1, 1]} : vector<8x512xf32> to vector<8x128xf32>
      %100 = arith.negf %99 : vector<8x128xf32>
      %101 = math.exp %100 : vector<8x128xf32>
      %cst_54 = arith.constant 1.000000e+00 : f32
      %102 = vector.broadcast %cst_54 : f32 to vector<8x128xf32>
      %103 = arith.addf %102, %101 : vector<8x128xf32>
      %104 = arith.divf %102, %103 : vector<8x128xf32>
      %105 = vector.extract_strided_slice %92 {offsets = [0, 256], sizes = [8, 128], strides = [1, 1]} : vector<8x512xf32> to vector<8x128xf32>
      %106 = math.tanh %105 : vector<8x128xf32>
      %107 = vector.extract_strided_slice %92 {offsets = [0, 384], sizes = [8, 128], strides = [1, 1]} : vector<8x512xf32> to vector<8x128xf32>
      %108 = arith.negf %107 : vector<8x128xf32>
      %109 = math.exp %108 : vector<8x128xf32>
      %cst_55 = arith.constant 1.000000e+00 : f32
      %110 = vector.broadcast %cst_55 : f32 to vector<8x128xf32>
      %111 = arith.addf %110, %109 : vector<8x128xf32>
      %112 = arith.divf %110, %111 : vector<8x128xf32>
      %113 = arith.mulf %104, %78 : vector<8x128xf32>
      %114 = arith.mulf %98, %106 : vector<8x128xf32>
      %115 = arith.addf %113, %114 : vector<8x128xf32>
      %116 = math.tanh %115 : vector<8x128xf32>
      %117 = arith.mulf %112, %116 : vector<8x128xf32>
      %118 = arith.index_cast %86 : i32 to index
      %c0_56 = arith.constant 0 : index
      %c0_57 = arith.constant 0 : index
      %119 = vector.load %arg13[%118, %c0_56, %c0_57] : memref<8x8x128xf32, #tpu.memory_space<vmem>>, vector<1x8x128xf32>
      %120 = vector.shape_cast %119 : vector<1x8x128xf32> to vector<8x128xf32>
      %121 = vector.shape_cast %117 : vector<8x128xf32> to vector<1x8x128xf32>
      tpu.vector_store %arg13[%118, %c0_56, %c0_57], %121 {strides = array<i32>} : memref<8x8x128xf32, #tpu.memory_space<vmem>>, vector<1x8x128xf32>,
      scf.yield %117, %115 : vector<8x128xf32>, vector<8x128xf32>
    }
    %c4_i32_15 = arith.constant 4 : i32
    %c0_16 = arith.constant 0 : index
    %c0_17 = arith.constant 0 : index
    %16 = vector.load %arg10[%c0_16, %c0_17] : memref<8x128xf32, #tpu.memory_space<vmem>>, vector<8x128xf32>
    tpu.vector_store %arg10[%c0_16, %c0_17], %15#0 {strides = array<i32>} : memref<8x128xf32, #tpu.memory_space<vmem>>, vector<8x128xf32>,
    %c0_18 = arith.constant 0 : index
    %c0_19 = arith.constant 0 : index
    %17 = vector.load %arg11[%c0_18, %c0_19] : memref<8x128xf32, #tpu.memory_space<vmem>>, vector<8x128xf32>
    tpu.vector_store %arg11[%c0_18, %c0_19], %15#1 {strides = array<i32>} : memref<8x128xf32, #tpu.memory_space<vmem>>, vector<8x128xf32>,
    %c8_i32 = arith.constant 8 : i32
    %18 = arith.muli %arg1, %c8_i32 : i32
    %19 = tpu.iota {dimensions = array<i32: 0>} : vector<8x8x1xi32>
    %20 = vector.broadcast %18 : i32 to vector<8x8x1xi32>
    %21 = arith.addi %19, %20 : vector<8x8x1xi32>
    %c0_20 = arith.constant 0 : index
    %c0_21 = arith.constant 0 : index
    %c0_22 = arith.constant 0 : index
    %22 = vector.load %arg2[%c0_20, %c0_21, %c0_22] : memref<1x8x1xi32, #tpu.memory_space<vmem>>, vector<1x8x1xi32>
    %23 = vector.broadcast %22 : vector<1x8x1xi32> to vector<8x8x1xi32>
    %24 = arith.cmpi slt, %21, %23 : vector<8x8x1xi32>
    %25 = arith.extui %24 : vector<8x8x1xi1> to vector<8x8x1xi32>
    %26 = arith.sitofp %25 : vector<8x8x1xi32> to vector<8x8x1xf32>
    %c0_23 = arith.constant 0 : index
    %c0_24 = arith.constant 0 : index
    %c0_25 = arith.constant 0 : index
    %27 = vector.load %arg13[%c0_23, %c0_24, %c0_25] : memref<8x8x128xf32, #tpu.memory_space<vmem>>, vector<8x8x128xf32>
    %28 = vector.broadcast %26 : vector<8x8x1xf32> to vector<8x8x128xf32>
    %29 = arith.mulf %27, %28 : vector<8x8x128xf32>
    %30 = vector.shape_cast %29 : vector<8x8x128xf32> to vector<64x128xf32>
    %c0_26 = arith.constant 0 : index
    %c0_27 = arith.constant 0 : index
    %31 = vector.load %arg7[%c0_26, %c0_27] : memref<128x128xf32, #tpu.memory_space<vmem>>, vector<128x128xf32>
    %cst_28 = arith.constant dense<0.000000e+00> : vector<64x128xf32>
    %32 = tpu.matmul %30, %31, %cst_28 {dimension_numbers = #tpu.dot_dimension_numbers<[1], [0], [0], [1], [0, 0, 1, 1], [], []>} : vector<64x128xf32>, vector<128x128xf32>, vector<64x128xf32> -> vector<64x128xf32>
    %c0_29 = arith.constant 0 : index
    %c0_30 = arith.constant 0 : index
    %33 = vector.load %arg8[%c0_29, %c0_30] : memref<1x128xf32, #tpu.memory_space<vmem>>, vector<1x128xf32>
    %34 = vector.broadcast %33 : vector<1x128xf32> to vector<64x128xf32>
    %35 = arith.addf %32, %34 : vector<64x128xf32>
    %cst_31 = arith.constant dense<0xFF800000> : vector<64xf32>
    %36 = vector.multi_reduction <maximumf>, %35, %cst_31 [1] : vector<64x128xf32> to vector<64xf32>
    %37 = vector.shape_cast %36 : vector<64xf32> to vector<64x1xf32>
    %38 = vector.broadcast %37 : vector<64x1xf32> to vector<64x128xf32>
    %39 = arith.subf %35, %38 : vector<64x128xf32>
    %40 = math.exp %39 : vector<64x128xf32>
    %cst_32 = arith.constant dense<0.000000e+00> : vector<64xf32>
    %41 = vector.multi_reduction <add>, %40, %cst_32 [1] : vector<64x128xf32> to vector<64xf32>
    %42 = vector.shape_cast %41 : vector<64xf32> to vector<64x1xf32>
    %43 = math.log %42 : vector<64x1xf32>
    %44 = arith.addf %43, %37 : vector<64x1xf32>
    %45 = vector.broadcast %44 : vector<64x1xf32> to vector<64x128xf32>
    %46 = arith.subf %35, %45 : vector<64x128xf32>
    %47 = vector.shape_cast %46 : vector<64x128xf32> to vector<8x8x128xf32>
    %c0_33 = arith.constant 0 : index
    %c0_34 = arith.constant 0 : index
    %c0_35 = arith.constant 0 : index
    %48 = vector.load %arg9[%c0_33, %c0_34, %c0_35] : memref<8x8x128xf32, #tpu.memory_space<vmem>>, vector<8x8x128xf32>
    tpu.vector_store %arg9[%c0_33, %c0_34, %c0_35], %47 {strides = array<i32>} : memref<8x8x128xf32, #tpu.memory_space<vmem>>, vector<8x8x128xf32>,
    return
  }
  func.func @transform_0(%arg0: i32, %arg1: i32) -> (i32, i32, i32) {
    %c0_i32 = arith.constant 0 : i32
    %c0_i32_0 = arith.constant 0 : i32
    %c0_i32_1 = arith.constant 0 : i32
    return %arg0, %c0_i32, %c0_i32_0 : i32, i32, i32
  }
  func.func @transform_1(%arg0: i32, %arg1: i32) -> (i32, i32, i32) {
    %c0_i32 = arith.constant 0 : i32
    %c0_i32_0 = arith.constant 0 : i32
    return %arg1, %arg0, %c0_i32 : i32, i32, i32
  }
  func.func @transform_2(%arg0: i32, %arg1: i32) -> (i32, i32) {
    %c0_i32 = arith.constant 0 : i32
    %c0_i32_0 = arith.constant 0 : i32
    %c0_i32_1 = arith.constant 0 : i32
    return %c0_i32, %c0_i32_0 : i32, i32
  }
  func.func @transform_3(%arg0: i32, %arg1: i32) -> (i32, i32) {
    %c0_i32 = arith.constant 0 : i32
    %c0_i32_0 = arith.constant 0 : i32
    %c0_i32_1 = arith.constant 0 : i32
    return %c0_i32, %c0_i32_0 : i32, i32
  }
  func.func @transform_4(%arg0: i32, %arg1: i32) -> (i32, i32) {
    %c0_i32 = arith.constant 0 : i32
    %c0_i32_0 = arith.constant 0 : i32
    %c0_i32_1 = arith.constant 0 : i32
    return %c0_i32, %c0_i32_0 : i32, i32
  }
  func.func @transform_5(%arg0: i32, %arg1: i32) -> (i32, i32) {
    %c0_i32 = arith.constant 0 : i32
    %c0_i32_0 = arith.constant 0 : i32
    %c0_i32_1 = arith.constant 0 : i32
    return %c0_i32, %c0_i32_0 : i32, i32
  }
  func.func @transform_6(%arg0: i32, %arg1: i32) -> (i32, i32) {
    %c0_i32 = arith.constant 0 : i32
    %c0_i32_0 = arith.constant 0 : i32
    %c0_i32_1 = arith.constant 0 : i32
    return %c0_i32, %c0_i32_0 : i32, i32
  }
  func.func @transform_7(%arg0: i32, %arg1: i32) -> (i32, i32, i32) {
    %c0_i32 = arith.constant 0 : i32
    %c0_i32_0 = arith.constant 0 : i32
    return %arg1, %arg0, %c0_i32 : i32, i32, i32
  }
}

</mosaic_0001>

<bundles_post_ra>
// kernel: rnn_tagger_forward.1
= control target key start
LH: loop header
LB: loop body
LE: loop exit
PB: predicated region body
PF: predicated region fallthrough
CT: control target
= control target key end

     0   :  { %s2183_s2 = inlined_call_operand.vmem [shape: f32[128,512], index: 2, kind: input, shape index: {}]   ;;  %s2184_s0 = inlined_call_operand.vmem [shape: s32[1,8,1], index: 0, kind: input, shape index: {}]   ;;  %s2185_s3 = inlined_call_operand.vmem [shape: f32[128,512], index: 3, kind: input, shape index: {}]   ;;  %s2186_s5 = inlined_call_operand.vmem [shape: f32[128,128], index: 5, kind: input, shape index: {}]   ;;  %s2187_s6 = inlined_call_operand.vmem [shape: f32[1,128], index: 6, kind: input, shape index: {}]   ;;  %s2188_s7 = inlined_call_operand.vmem [shape: f32[8,8,128], index: 7, kind: output, shape index: {}]   ;;  %s2189_s1 = inlined_call_operand.vmem [shape: f32[8,8,128], index: 1, kind: input, shape index: {}]   ;;  %s2190_s4 = inlined_call_operand.vmem [shape: f32[1,512], index: 4, kind: input, shape index: {}]  }
   0x1   :  { %v102_v0 = vld [vmem:[%s2183_s2 + $0x1f0] sm:$0xff]  ;;  %v103_v1 = vld [vmem:[%s2183_s2 + $0x1f8] sm:$0xff]  ;;  %v100_v6 = vld [vmem:[%s2183_s2 + $0x1e0] sm:$0xff] }
   0x2   :  { %v98_v2 = vld [vmem:[%s2183_s2 + $0x1d0] sm:$0xff]  ;;  %196 = vmatpush.msra.mxu2 %v102_v0  ;;  %237 = vmatpush.msra.mxu3 %v103_v1  ;;  %v99_v3 = vld [vmem:[%s2183_s2 + $0x1d8] sm:$0xff]  ;;  %v101_v7 = vld [vmem:[%s2183_s2 + $0x1e8] sm:$0xff] }
   0x3   :  { %v94_v4 = vld [vmem:[%s2183_s2 + $0x1b0] sm:$0xff]  ;;  %v95_v5 = vld [vmem:[%s2183_s2 + $0x1b8] sm:$0xff]  ;;  %v96_v8 = vld [vmem:[%s2183_s2 + $0x1c0] sm:$0xff]  ;;  %114 = vmatpush.msra.mxu0 %v100_v6  ;;  %155 = vmatpush.msra.mxu1 %v101_v7 }
   0x4   :  { %197 = vmatpush.msra.mxu2 %v98_v2  ;;  %238 = vmatpush.msra.mxu3 %v99_v3  ;;  %v97_v9 = vld [vmem:[%s2183_s2 + $0x1c8] sm:$0xff]  ;;  %v90_v10 = vld [vmem:[%s2183_s2 + $0x190] sm:$0xff]  ;;  %v91_v11 = vld [vmem:[%s2183_s2 + $0x198] sm:$0xff] }
   0x5   :  { %v92_v12 = vld [vmem:[%s2183_s2 + $0x1a0] sm:$0xff]  ;;  %v93_v13 = vld [vmem:[%s2183_s2 + $0x1a8] sm:$0xff]  ;;  %115 = vmatpush.msra.mxu0 %v96_v8  ;;  %156 = vmatpush.msra.mxu1 %v97_v9  ;;  %v86_v14 = vld [vmem:[%s2183_s2 + $0x170] sm:$0xff] }
   0x6   :  { %198 = vmatpush.msra.mxu2 %v94_v4  ;;  %239 = vmatpush.msra.mxu3 %v95_v5  ;;  %v87_v15 = vld [vmem:[%s2183_s2 + $0x178] sm:$0xff]  ;;  %v88_v16 = vld [vmem:[%s2183_s2 + $0x180] sm:$0xff]  ;;  %v89_v17 = vld [vmem:[%s2183_s2 + $0x188] sm:$0xff] }
   0x7   :  { %116 = vmatpush.msra.mxu0 %v92_v12  ;;  %157 = vmatpush.msra.mxu1 %v93_v13  ;;  %v82_v18 = vld [vmem:[%s2183_s2 + $0x150] sm:$0xff]  ;;  %v83_v19 = vld [vmem:[%s2183_s2 + $0x158] sm:$0xff]  ;;  %v84_v20 = vld [vmem:[%s2183_s2 + $0x160] sm:$0xff] }
   0x8   :  { %199 = vmatpush.msra.mxu2 %v90_v10  ;;  %240 = vmatpush.msra.mxu3 %v91_v11  ;;  %v85_v21 = vld [vmem:[%s2183_s2 + $0x168] sm:$0xff]  ;;  %v78_v22 = vld [vmem:[%s2183_s2 + $0x130] sm:$0xff]  ;;  %v79_v23 = vld [vmem:[%s2183_s2 + $0x138] sm:$0xff] }
   0x9   :  { %117 = vmatpush.msra.mxu0 %v88_v16  ;;  %158 = vmatpush.msra.mxu1 %v89_v17  ;;  %v80_v24 = vld [vmem:[%s2183_s2 + $0x140] sm:$0xff]  ;;  %v81_v25 = vld [vmem:[%s2183_s2 + $0x148] sm:$0xff]  ;;  %v74_v26 = vld [vmem:[%s2183_s2 + $0x110] sm:$0xff] }
   0xa   :  { %200 = vmatpush.msra.mxu2 %v86_v14  ;;  %241 = vmatpush.msra.mxu3 %v87_v15  ;;  %v75_v27 = vld [vmem:[%s2183_s2 + $0x118] sm:$0xff]  ;;  %v76_v28 = vld [vmem:[%s2183_s2 + $0x120] sm:$0xff]  ;;  %v77_v29 = vld [vmem:[%s2183_s2 + $0x128] sm:$0xff] }
   0xb   :  { %118 = vmatpush.msra.mxu0 %v84_v20  ;;  %159 = vmatpush.msra.mxu1 %v85_v21  ;;  %v70_v30 = vld [vmem:[%s2183_s2 + $0xf0] sm:$0xff]  ;;  %v71_v31 = vld [vmem:[%s2183_s2 + $0xf8] sm:$0xff]  ;;  %v72_v32 = vld [vmem:[%s2183_s2 + $0x100] sm:$0xff] }
   0xc   :  { %201 = vmatpush.msra.mxu2 %v82_v18  ;;  %242 = vmatpush.msra.mxu3 %v83_v19  ;;  %v73_v33 = vld [vmem:[%s2183_s2 + $0x108] sm:$0xff]  ;;  %v66_v34 = vld [vmem:[%s2183_s2 + $0xd0] sm:$0xff]  ;;  %v67_v35 = vld [vmem:[%s2183_s2 + $0xd8] sm:$0xff] }
   0xd   :  { %119 = vmatpush.msra.mxu0 %v80_v24  ;;  %160 = vmatpush.msra.mxu1 %v81_v25  ;;  %v68_v36 = vld [vmem:[%s2183_s2 + $0xe0] sm:$0xff]  ;;  %v69_v37 = vld [vmem:[%s2183_s2 + $0xe8] sm:$0xff]  ;;  %v62_v38 = vld [vmem:[%s2183_s2 + $0xb0] sm:$0xff] }
   0xe   :  { %202 = vmatpush.msra.mxu2 %v78_v22  ;;  %243 = vmatpush.msra.mxu3 %v79_v23  ;;  %v63_v39 = vld [vmem:[%s2183_s2 + $0xb8] sm:$0xff]  ;;  %v64_v40 = vld [vmem:[%s2183_s2 + $0xc0] sm:$0xff]  ;;  %v65_v41 = vld [vmem:[%s2183_s2 + $0xc8] sm:$0xff] }
   0xf   :  { %120 = vmatpush.msra.mxu0 %v76_v28  ;;  %161 = vmatpush.msra.mxu1 %v77_v29  ;;  %v58_v42 = vld [vmem:[%s2183_s2 + $0x90] sm:$0xff]  ;;  %v59_v43 = vld [vmem:[%s2183_s2 + $0x98] sm:$0xff]  ;;  %v60_v44 = vld [vmem:[%s2183_s2 + $0xa0] sm:$0xff] }
  0x10   :  { %203 = vmatpush.msra.mxu2 %v74_v26  ;;  %244 = vmatpush.msra.mxu3 %v75_v27  ;;  %v61_v45 = vld [vmem:[%s2183_s2 + $0xa8] sm:$0xff]  ;;  %v54_v46 = vld [vmem:[%s2183_s2 + $0x70] sm:$0xff]  ;;  %v55_v47 = vld [vmem:[%s2183_s2 + $0x78] sm:$0xff] }
  0x11   :  { %121 = vmatpush.msra.mxu0 %v72_v32  ;;  %162 = vmatpush.msra.mxu1 %v73_v33  ;;  %v56_v48 = vld [vmem:[%s2183_s2 + $0x80] sm:$0xff]  ;;  %v57_v49 = vld [vmem:[%s2183_s2 + $0x88] sm:$0xff]  ;;  %v50_v50 = vld [vmem:[%s2183_s2 + $0x50] sm:$0xff] }
  0x12   :  { %204 = vmatpush.msra.mxu2 %v70_v30  ;;  %245 = vmatpush.msra.mxu3 %v71_v31  ;;  %v51_v51 = vld [vmem:[%s2183_s2 + $0x58] sm:$0xff]  ;;  %v52_v52 = vld [vmem:[%s2183_s2 + $0x60] sm:$0xff]  ;;  %v53_v53 = vld [vmem:[%s2183_s2 + $0x68] sm:$0xff] }
  0x13   :  { %122 = vmatpush.msra.mxu0 %v68_v36  ;;  %163 = vmatpush.msra.mxu1 %v69_v37  ;;  %v46_v54 = vld [vmem:[%s2183_s2 + $0x30] sm:$0xff]  ;;  %v47_v55 = vld [vmem:[%s2183_s2 + $0x38] sm:$0xff]  ;;  %v48_v56 = vld [vmem:[%s2183_s2 + $0x40] sm:$0xff] }
  0x14   :  { %205 = vmatpush.msra.mxu2 %v66_v34  ;;  %246 = vmatpush.msra.mxu3 %v67_v35  ;;  %v49_v57 = vld [vmem:[%s2183_s2 + $0x48] sm:$0xff]  ;;  %v42_v58 = vld [vmem:[%s2183_s2 + $0x10] sm:$0xff]  ;;  %v43_v59 = vld [vmem:[%s2183_s2 + $0x18] sm:$0xff] }
  0x15   :  { %123 = vmatpush.msra.mxu0 %v64_v40  ;;  %164 = vmatpush.msra.mxu1 %v65_v41  ;;  %v32_v60 = vld [vmem:[%s2189_s1] sm:$0xff]  ;;  %v45_v62 = vld [vmem:[%s2183_s2 + $0x28] sm:$0xff]  ;;  %v34_v2 = vld [vmem:[%s2189_s1 + $0x10] sm:$0xff] }
  0x16   :  { %206 = vmatpush.msra.mxu2 %v62_v38  ;;  %247 = vmatpush.msra.mxu3 %v63_v39  ;;  %v44_v61 = vld [vmem:[%s2183_s2 + $0x20] sm:$0xff]  ;;  %v41_v0 = vld [vmem:[%s2183_s2 + $0x8] sm:$0xff]  ;;  %v35_v3 = vld [vmem:[%s2189_s1 + $0x18] sm:$0xff] }
  0x17   :  { %124 = vmatpush.msra.mxu0 %v60_v44  ;;  %165 = vmatpush.msra.mxu1 %v61_v45  ;;  %v40_v63 = vld [vmem:[%s2183_s2] sm:$0xff]  ;;  %v33_v1 = vld [vmem:[%s2189_s1 + $0x8] sm:$0xff]  ;;  %v38_v6 = vld [vmem:[%s2189_s1 + $0x30] sm:$0xff] }
  0x18   :  { %207 = vmatpush.msra.mxu2 %v58_v42  ;;  %248 = vmatpush.msra.mxu3 %v59_v43  ;;  %v36_v4 = vld [vmem:[%s2189_s1 + $0x20] sm:$0xff]  ;;  %v37_v5 = vld [vmem:[%s2189_s1 + $0x28] sm:$0xff]  ;;  %v39_v7 = vld [vmem:[%s2189_s1 + $0x38] sm:$0xff]  ;;  %s1570_s1 = smov 0  }
  0x19   :  { %125 = vmatpush.msra.mxu0 %v56_v48  ;;  %166 = vmatpush.msra.mxu1 %v57_v49  ;;  %v104_v8 = vld [vmem:[%s2190_s4] sm:$0xf] }
  0x1a   :  { %208 = vmatpush.msra.mxu2 %v54_v46  ;;  %249 = vmatpush.msra.mxu3 %v55_v47  ;;  %v1526_v9 = vperm.slane %v104_v8, 0  ;;  %v1528_v10 = vperm.slane %v104_v8, 1  ;;  %v1530_v11 = vperm.slane %v104_v8, 2  ;;  %v1532_v12 = vperm.slane %v104_v8, 3 }
  0x1b   :  { %126 = vmatpush.msra.mxu0 %v52_v52  ;;  %167 = vmatpush.msra.mxu1 %v53_v53 }
  0x1c   :  { %209 = vmatpush.msra.mxu2 %v50_v50  ;;  %250 = vmatpush.msra.mxu3 %v51_v51 }
  0x1d   :  { %127 = vmatpush.msra.mxu0 %v48_v56  ;;  %168 = vmatpush.msra.mxu1 %v49_v57 }
  0x1e   :  { %210 = vmatpush.msra.mxu2 %v46_v54  ;;  %251 = vmatpush.msra.mxu3 %v47_v55 }
  0x1f   :  { %128 = vmatpush.msra.mxu0 %v44_v61  ;;  %169 = vmatpush.msra.mxu1 %v45_v62 }
  0x20   :  { %211 = vmatpush.msra.mxu2 %v42_v58  ;;  %252 = vmatpush.msra.mxu3 %v43_v59 }
  0x21   :  { %212 = vmatmul.f32.vlgmr.msra.gmra.mxu2 %v32_v60  ;;  %253 = vmatmul.f32.vlgmr.msra.gmra.mxu3 %v32_v60 }
  0x22   :  { %129 = vmatpush.msra.mxu0 %v40_v63  ;;  %170 = vmatpush.msra.mxu1 %v41_v0 }
  0x23   :  { %130 = vmatmul.f32.vlgmr.msra.gmra.mxu0 %v32_v60  ;;  %171 = vmatmul.f32.vlgmr.msra.gmra.mxu1 %v32_v60 }
  0x29   :  { %215 = vmatmul.f32.gmra.mxu2 %v33_v1  ;;  %256 = vmatmul.f32.gmra.mxu3 %v33_v1 }
  0x2b   :  { %133 = vmatmul.f32.gmra.mxu0 %v33_v1  ;;  %174 = vmatmul.f32.gmra.mxu1 %v33_v1 }
  0x31   :  { %218 = vmatmul.f32.gmra.mxu2 %v34_v2  ;;  %259 = vmatmul.f32.gmra.mxu3 %v34_v2 }
  0x33   :  { %136 = vmatmul.f32.gmra.mxu0 %v34_v2  ;;  %177 = vmatmul.f32.gmra.mxu1 %v34_v2 }
  0x39   :  { %221 = vmatmul.f32.gmra.mxu2 %v35_v3  ;;  %262 = vmatmul.f32.gmra.mxu3 %v35_v3 }
  0x3b   :  { %139 = vmatmul.f32.gmra.mxu0 %v35_v3  ;;  %180 = vmatmul.f32.gmra.mxu1 %v35_v3 }
  0x41   :  { %224 = vmatmul.f32.gmra.mxu2 %v36_v4  ;;  %265 = vmatmul.f32.gmra.mxu3 %v36_v4 }
  0x43   :  { %142 = vmatmul.f32.gmra.mxu0 %v36_v4  ;;  %183 = vmatmul.f32.gmra.mxu1 %v36_v4 }
  0x49   :  { %227 = vmatmul.f32.gmra.mxu2 %v37_v5  ;;  %268 = vmatmul.f32.gmra.mxu3 %v37_v5 }
  0x4b   :  { %145 = vmatmul.f32.gmra.mxu0 %v37_v5  ;;  %186 = vmatmul.f32.gmra.mxu1 %v37_v5 }
  0x51   :  { %230 = vmatmul.f32.gmra.mxu2 %v38_v6  ;;  %271 = vmatmul.f32.gmra.mxu3 %v38_v6 }
  0x53   :  { %148 = vmatmul.f32.gmra.mxu0 %v38_v6  ;;  %189 = vmatmul.f32.gmra.mxu1 %v38_v6 }
  0x59   :  { %233 = vmatmul.f32.gmra.mxu2 %v39_v7  ;;  %274 = vmatmul.f32.gmra.mxu3 %v39_v7 }
  0x5b   :  { %151 = vmatmul.f32.gmra.mxu0 %v39_v7  ;;  %192 = vmatmul.f32.gmra.mxu1 %v39_v7 }
  0xa0   :  { %v131_v13 = vpop.f32.mrf.mxu0  ;;  %v172_v14 = vpop.f32.mrf.mxu1 }
  0xa1   :  { %v132_v15 = vadd.f32 %v131_v13, %v1526_v9  ;;  %v173_v16 = vadd.f32 %v172_v14, %v1528_v10 }
  0xa3   :  { %278 = vst [vmem:[#allocation4] sm:$0xff] %v132_v15 }
  0xa4   :  { %v213_v17 = vpop.f32.mrf.mxu2  ;;  %v254_v18 = vpop.f32.mrf.mxu3  ;;  %279 = vst [vmem:[#allocation4 + $0x8] sm:$0xff] %v173_v16 }
  0xa5   :  { %v214_v19 = vadd.f32 %v213_v17, %v1530_v11  ;;  %v255_v20 = vadd.f32 %v254_v18, %v1532_v12  ;;  %v1566_v17 = vmov 0.0   ;;  %v1568_v18 = vmov 0.0  }
  0xa7   :  { %280 = vst [vmem:[#allocation4 + $0x10] sm:$0xff] %v214_v19 }
  0xa8   :  { %281 = vst [vmem:[#allocation4 + $0x18] sm:$0xff] %v255_v20  ;;  %v134_v21 = vpop.f32.mrf.mxu0  ;;  %v175_v22 = vpop.f32.mrf.mxu1 }
  0xa9   :  { %v135_v23 = vadd.f32 %v134_v21, %v1526_v9  ;;  %v176_v24 = vadd.f32 %v175_v22, %v1528_v10 }
  0xab   :  { %282 = vst [vmem:[#allocation4 + $0x20] sm:$0xff] %v135_v23 }
  0xac   :  { %v216_v25 = vpop.f32.mrf.mxu2  ;;  %v257_v26 = vpop.f32.mrf.mxu3  ;;  %283 = vst [vmem:[#allocation4 + $0x28] sm:$0xff] %v176_v24 }
  0xad   :  { %v217_v27 = vadd.f32 %v216_v25, %v1530_v11  ;;  %v258_v28 = vadd.f32 %v257_v26, %v1532_v12 }
  0xaf   :  { %284 = vst [vmem:[#allocation4 + $0x30] sm:$0xff] %v217_v27 }
  0xb0   :  { %285 = vst [vmem:[#allocation4 + $0x38] sm:$0xff] %v258_v28  ;;  %v137_v29 = vpop.f32.mrf.mxu0  ;;  %v178_v30 = vpop.f32.mrf.mxu1 }
  0xb1   :  { %v138_v31 = vadd.f32 %v137_v29, %v1526_v9  ;;  %v179_v32 = vadd.f32 %v178_v30, %v1528_v10 }
  0xb3   :  { %286 = vst [vmem:[#allocation4 + $0x40] sm:$0xff] %v138_v31 }
  0xb4   :  { %v219_v33 = vpop.f32.mrf.mxu2  ;;  %v260_v34 = vpop.f32.mrf.mxu3  ;;  %287 = vst [vmem:[#allocation4 + $0x48] sm:$0xff] %v179_v32 }
  0xb5   :  { %v220_v35 = vadd.f32 %v219_v33, %v1530_v11  ;;  %v261_v36 = vadd.f32 %v260_v34, %v1532_v12 }
  0xb7   :  { %288 = vst [vmem:[#allocation4 + $0x50] sm:$0xff] %v220_v35 }
  0xb8   :  { %289 = vst [vmem:[#allocation4 + $0x58] sm:$0xff] %v261_v36  ;;  %v140_v37 = vpop.f32.mrf.mxu0  ;;  %v181_v38 = vpop.f32.mrf.mxu1 }
  0xb9   :  { %v141_v39 = vadd.f32 %v140_v37, %v1526_v9  ;;  %v182_v40 = vadd.f32 %v181_v38, %v1528_v10 }
  0xbb   :  { %290 = vst [vmem:[#allocation4 + $0x60] sm:$0xff] %v141_v39 }
  0xbc   :  { %v222_v41 = vpop.f32.mrf.mxu2  ;;  %v263_v42 = vpop.f32.mrf.mxu3  ;;  %291 = vst [vmem:[#allocation4 + $0x68] sm:$0xff] %v182_v40 }
  0xbd   :  { %v223_v43 = vadd.f32 %v222_v41, %v1530_v11  ;;  %v264_v44 = vadd.f32 %v263_v42, %v1532_v12 }
  0xbf   :  { %292 = vst [vmem:[#allocation4 + $0x70] sm:$0xff] %v223_v43 }
  0xc0   :  { %293 = vst [vmem:[#allocation4 + $0x78] sm:$0xff] %v264_v44  ;;  %v143_v45 = vpop.f32.mrf.mxu0  ;;  %v184_v46 = vpop.f32.mrf.mxu1 }
  0xc1   :  { %v144_v47 = vadd.f32 %v143_v45, %v1526_v9  ;;  %v185_v48 = vadd.f32 %v184_v46, %v1528_v10 }
  0xc3   :  { %294 = vst [vmem:[#allocation4 + $0x80] sm:$0xff] %v144_v47 }
  0xc4   :  { %v225_v49 = vpop.f32.mrf.mxu2  ;;  %v266_v50 = vpop.f32.mrf.mxu3  ;;  %295 = vst [vmem:[#allocation4 + $0x88] sm:$0xff] %v185_v48 }
  0xc5   :  { %v226_v51 = vadd.f32 %v225_v49, %v1530_v11  ;;  %v267_v52 = vadd.f32 %v266_v50, %v1532_v12 }
  0xc7   :  { %296 = vst [vmem:[#allocation4 + $0x90] sm:$0xff] %v226_v51 }
  0xc8   :  { %297 = vst [vmem:[#allocation4 + $0x98] sm:$0xff] %v267_v52  ;;  %v146_v53 = vpop.f32.mrf.mxu0  ;;  %v187_v54 = vpop.f32.mrf.mxu1 }
  0xc9   :  { %v147_v55 = vadd.f32 %v146_v53, %v1526_v9  ;;  %v188_v56 = vadd.f32 %v187_v54, %v1528_v10 }
  0xcb   :  { %298 = vst [vmem:[#allocation4 + $0xa0] sm:$0xff] %v147_v55 }
  0xcc   :  { %v228_v57 = vpop.f32.mrf.mxu2  ;;  %v269_v58 = vpop.f32.mrf.mxu3  ;;  %299 = vst [vmem:[#allocation4 + $0xa8] sm:$0xff] %v188_v56 }
  0xcd   :  { %v229_v59 = vadd.f32 %v228_v57, %v1530_v11  ;;  %v270_v60 = vadd.f32 %v269_v58, %v1532_v12 }
  0xcf   :  { %300 = vst [vmem:[#allocation4 + $0xb0] sm:$0xff] %v229_v59 }
  0xd0   :  { %301 = vst [vmem:[#allocation4 + $0xb8] sm:$0xff] %v270_v60  ;;  %v149_v61 = vpop.f32.mrf.mxu0  ;;  %v190_v62 = vpop.f32.mrf.mxu1 }
  0xd1   :  { %v150_v63 = vadd.f32 %v149_v61, %v1526_v9  ;;  %v191_v0 = vadd.f32 %v190_v62, %v1528_v10 }
  0xd3   :  { %302 = vst [vmem:[#allocation4 + $0xc0] sm:$0xff] %v150_v63 }
  0xd4   :  { %v231_v1 = vpop.f32.mrf.mxu2  ;;  %v272_v2 = vpop.f32.mrf.mxu3  ;;  %303 = vst [vmem:[#allocation4 + $0xc8] sm:$0xff] %v191_v0 }
  0xd5   :  { %v232_v3 = vadd.f32 %v231_v1, %v1530_v11  ;;  %v273_v4 = vadd.f32 %v272_v2, %v1532_v12 }
  0xd7   :  { %304 = vst [vmem:[#allocation4 + $0xd0] sm:$0xff] %v232_v3 }
  0xd8   :  { %305 = vst [vmem:[#allocation4 + $0xd8] sm:$0xff] %v273_v4  ;;  %v152_v5 = vpop.f32.mrf.mxu0  ;;  %v193_v6 = vpop.f32.mrf.mxu1 }
  0xd9   :  { %v153_v7 = vadd.f32 %v152_v5, %v1526_v9  ;;  %v194_v8 = vadd.f32 %v193_v6, %v1528_v10 }
  0xdb   :  { %306 = vst [vmem:[#allocation4 + $0xe0] sm:$0xff] %v153_v7 }
  0xdc   :  { %v234_v13 = vpop.f32.mrf.mxu2  ;;  %v275_v14 = vpop.f32.mrf.mxu3  ;;  %307 = vst [vmem:[#allocation4 + $0xe8] sm:$0xff] %v194_v8 }
  0xdd   :  { %v235_v15 = vadd.f32 %v234_v13, %v1530_v11  ;;  %v276_v16 = vadd.f32 %v275_v14, %v1532_v12 }
  0xdf   :  { %308 = vst [vmem:[#allocation4 + $0xf0] sm:$0xff] %v235_v15 }
  0xe0   :  { %309 = vst [vmem:[#allocation4 + $0xf8] sm:$0xff] %v276_v16 }
  0xe1 LB: > { %2191 = vst [vmem:[#allocation6_spill] sm:$0xff] %v1255_v17  ;;  %v1584_v9 = vld [vmem:[%s2185_s3 + $0x1e0] sm:$0xff]  ;;  %v1589_v10 = vld [vmem:[%s2185_s3 + $0x1e8] sm:$0xff]  ;;  %v1594_v11 = vld [vmem:[%s2185_s3 + $0x1f8] sm:$0xff]  ;;  %s1076_s10 = sshll.u32 %s1263_s1, 6  ;;  %s1077_s12 = sshll.u32 %s1263_s1, 4  ;;  %s1263_s1 = sphi %s1570_s1, %s317_s1   ;;  %v1259_v18 = vphi %v1568_v18, %v760_v18   ;;  %v1255_v17 = vphi %v1566_v17, %v758_v17  }
  0xe2   : > { %392 = vmatpush.msra.mxu0 %v1584_v9  ;;  %412 = vmatpush.msra.mxu1 %v1589_v10  ;;  %v1601_v12 = vld [vmem:[%s2185_s3 + $0x1c0] sm:$0xff]  ;;  %v1606_v19 = vld [vmem:[%s2185_s3 + $0x1c8] sm:$0xff]  ;;  %v1611_v20 = vld [vmem:[%s2185_s3 + $0x1d8] sm:$0xff]  ;;  %s2030_s11 = scalar_lea.vmem [#allocation4], %s1076_s10  ;;  %s2041_s13 = scalar_lea.vmem [#allocation5], %s1077_s12 }
  0xe3   : > { %452 = vmatpush.msra.mxu3 %v1594_v11  ;;  %v1617_v21 = vld [vmem:[%s2185_s3 + $0x1a0] sm:$0xff]  ;;  %v1622_v22 = vld [vmem:[%s2185_s3 + $0x1a8] sm:$0xff]  ;;  %v1629_v23 = vld [vmem:[%s2185_s3 + $0x1b8] sm:$0xff]  ;;  %s317_s1 = sadd.s32 1, %s1263_s1  }
  0xe4   : > { %393 = vmatpush.msra.mxu0 %v1601_v12  ;;  %413 = vmatpush.msra.mxu1 %v1606_v19  ;;  %v1635_v24 = vld [vmem:[%s2185_s3 + $0x180] sm:$0xff]  ;;  %v1640_v25 = vld [vmem:[%s2185_s3 + $0x188] sm:$0xff]  ;;  %v1647_v26 = vld [vmem:[%s2185_s3 + $0x198] sm:$0xff]  ;;  %p314_p0 = scmp.ge.s32.totalorder %s317_s1, 4  }
  0xe5   : > { %453 = vmatpush.msra.mxu3 %v1611_v20  ;;  %v1653_v27 = vld [vmem:[%s2185_s3 + $0x160] sm:$0xff]  ;;  %v1658_v28 = vld [vmem:[%s2185_s3 + $0x168] sm:$0xff]  ;;  %v1665_v29 = vld [vmem:[%s2185_s3 + $0x178] sm:$0xff] }
  0xe6   : > { %394 = vmatpush.msra.mxu0 %v1617_v21  ;;  %414 = vmatpush.msra.mxu1 %v1622_v22  ;;  %v1671_v30 = vld [vmem:[%s2185_s3 + $0x140] sm:$0xff]  ;;  %v1676_v31 = vld [vmem:[%s2185_s3 + $0x148] sm:$0xff]  ;;  %v1681_v32 = vld [vmem:[%s2185_s3 + $0x1f0] sm:$0xff] }
  0xe7   : > { %454 = vmatpush.msra.mxu3 %v1629_v23  ;;  %v1688_v33 = vld [vmem:[%s2185_s3 + $0x158] sm:$0xff]  ;;  %v1693_v34 = vld [vmem:[%s2185_s3 + $0x1d0] sm:$0xff]  ;;  %v1699_v35 = vld [vmem:[%s2185_s3 + $0x120] sm:$0xff]  ;;  %432 = vmatpush.msra.mxu2 %v1681_v32 }
  0xe8   : > { %395 = vmatpush.msra.mxu0 %v1635_v24  ;;  %415 = vmatpush.msra.mxu1 %v1640_v25  ;;  %v1704_v36 = vld [vmem:[%s2185_s3 + $0x128] sm:$0xff]  ;;  %v1712_v37 = vld [vmem:[%s2185_s3 + $0x138] sm:$0xff]  ;;  %v1717_v38 = vld [vmem:[%s2185_s3 + $0x1b0] sm:$0xff] }
  0xe9   : > { %455 = vmatpush.msra.mxu3 %v1647_v26  ;;  %v1723_v39 = vld [vmem:[%s2185_s3 + $0x100] sm:$0xff]  ;;  %v1728_v40 = vld [vmem:[%s2185_s3 + $0x108] sm:$0xff]  ;;  %433 = vmatpush.msra.mxu2 %v1693_v34  ;;  %v1736_v41 = vld [vmem:[%s2185_s3 + $0x118] sm:$0xff] }
  0xea   : > { %396 = vmatpush.msra.mxu0 %v1653_v27  ;;  %416 = vmatpush.msra.mxu1 %v1658_v28  ;;  %v1741_v42 = vld [vmem:[%s2185_s3 + $0x190] sm:$0xff]  ;;  %v1747_v43 = vld [vmem:[%s2185_s3 + $0xe0] sm:$0xff]  ;;  %v1752_v44 = vld [vmem:[%s2185_s3 + $0xe8] sm:$0xff] }
  0xeb   : > { %456 = vmatpush.msra.mxu3 %v1665_v29  ;;  %434 = vmatpush.msra.mxu2 %v1717_v38  ;;  %v1760_v45 = vld [vmem:[%s2185_s3 + $0xf8] sm:$0xff]  ;;  %v1765_v46 = vld [vmem:[%s2185_s3 + $0x170] sm:$0xff]  ;;  %v1771_v47 = vld [vmem:[%s2185_s3 + $0xc0] sm:$0xff] }
  0xec   : > { %397 = vmatpush.msra.mxu0 %v1671_v30  ;;  %417 = vmatpush.msra.mxu1 %v1676_v31  ;;  %v1776_v48 = vld [vmem:[%s2185_s3 + $0xc8] sm:$0xff]  ;;  %v1784_v49 = vld [vmem:[%s2185_s3 + $0xd8] sm:$0xff]  ;;  %v1789_v50 = vld [vmem:[%s2185_s3 + $0x150] sm:$0xff] }
  0xed   : > { %457 = vmatpush.msra.mxu3 %v1688_v33  ;;  %435 = vmatpush.msra.mxu2 %v1741_v42  ;;  %v1795_v51 = vld [vmem:[%s2185_s3 + $0xa0] sm:$0xff]  ;;  %v1800_v52 = vld [vmem:[%s2185_s3 + $0xa8] sm:$0xff]  ;;  %v1808_v53 = vld [vmem:[%s2185_s3 + $0xb8] sm:$0xff] }
  0xee   : > { %398 = vmatpush.msra.mxu0 %v1699_v35  ;;  %418 = vmatpush.msra.mxu1 %v1704_v36  ;;  %v1813_v54 = vld [vmem:[%s2185_s3 + $0x130] sm:$0xff]  ;;  %v1819_v55 = vld [vmem:[%s2185_s3 + $0x80] sm:$0xff]  ;;  %v1824_v56 = vld [vmem:[%s2185_s3 + $0x88] sm:$0xff] }
  0xef   : > { %458 = vmatpush.msra.mxu3 %v1712_v37  ;;  %436 = vmatpush.msra.mxu2 %v1765_v46  ;;  %v1832_v57 = vld [vmem:[%s2185_s3 + $0x98] sm:$0xff]  ;;  %v1837_v58 = vld [vmem:[%s2185_s3 + $0x110] sm:$0xff]  ;;  %v1843_v59 = vld [vmem:[%s2185_s3 + $0x60] sm:$0xff] }
  0xf0   : > { %399 = vmatpush.msra.mxu0 %v1723_v39  ;;  %419 = vmatpush.msra.mxu1 %v1728_v40  ;;  %v1848_v60 = vld [vmem:[%s2185_s3 + $0x68] sm:$0xff]  ;;  %v1856_v61 = vld [vmem:[%s2185_s3 + $0x78] sm:$0xff]  ;;  %v1861_v62 = vld [vmem:[%s2185_s3 + $0xf0] sm:$0xff] }
  0xf1   : > { %459 = vmatpush.msra.mxu3 %v1736_v41  ;;  %437 = vmatpush.msra.mxu2 %v1789_v50  ;;  %v1867_v63 = vld [vmem:[%s2185_s3 + $0x40] sm:$0xff]  ;;  %v1872_v0 = vld [vmem:[%s2185_s3 + $0x48] sm:$0xff]  ;;  %v1880_v1 = vld [vmem:[%s2185_s3 + $0x58] sm:$0xff] }
  0xf2   : > { %400 = vmatpush.msra.mxu0 %v1747_v43  ;;  %420 = vmatpush.msra.mxu1 %v1752_v44  ;;  %v1885_v2 = vld [vmem:[%s2185_s3 + $0xd0] sm:$0xff]  ;;  %v1891_v3 = vld [vmem:[%s2185_s3 + $0x20] sm:$0xff]  ;;  %v1896_v4 = vld [vmem:[%s2185_s3 + $0x28] sm:$0xff] }
  0xf3   : > { %460 = vmatpush.msra.mxu3 %v1760_v45  ;;  %438 = vmatpush.msra.mxu2 %v1813_v54  ;;  %v1904_v5 = vld [vmem:[%s2185_s3 + $0x38] sm:$0xff]  ;;  %v1909_v6 = vld [vmem:[%s2185_s3 + $0xb0] sm:$0xff]  ;;  %v1915_v7 = vld [vmem:[%s2185_s3] sm:$0xff] }
  0xf4   : > { %401 = vmatpush.msra.mxu0 %v1771_v47  ;;  %421 = vmatpush.msra.mxu1 %v1776_v48  ;;  %v1920_v8 = vld [vmem:[%s2185_s3 + $0x8] sm:$0xff]  ;;  %v1928_v13 = vld [vmem:[%s2185_s3 + $0x18] sm:$0xff]  ;;  %v1937_v14 = vld [vmem:[%s2185_s3 + $0x90] sm:$0xff] }
  0xf5   : > { %461 = vmatpush.msra.mxu3 %v1784_v49  ;;  %439 = vmatpush.msra.mxu2 %v1837_v58  ;;  %v1946_v15 = vld [vmem:[%s2185_s3 + $0x70] sm:$0xff] }
  0xf6   : > { %402 = vmatpush.msra.mxu0 %v1795_v51  ;;  %422 = vmatpush.msra.mxu1 %v1800_v52  ;;  %v1953_v16 = vld [vmem:[%s2185_s3 + $0x50] sm:$0xff] }
  0xf7   : > { %462 = vmatpush.msra.mxu3 %v1808_v53  ;;  %440 = vmatpush.msra.mxu2 %v1861_v62  ;;  %v1962_v17 = vld [vmem:[%s2185_s3 + $0x30] sm:$0xff] }
  0xf8   : > { %403 = vmatpush.msra.mxu0 %v1819_v55  ;;  %423 = vmatpush.msra.mxu1 %v1824_v56 }
  0xf9   : > { %463 = vmatpush.msra.mxu3 %v1832_v57  ;;  %441 = vmatpush.msra.mxu2 %v1885_v2 }
  0xfa   : > { %404 = vmatpush.msra.mxu0 %v1843_v59  ;;  %424 = vmatpush.msra.mxu1 %v1848_v60 }
  0xfb   : > { %464 = vmatpush.msra.mxu3 %v1856_v61  ;;  %442 = vmatpush.msra.mxu2 %v1909_v6 }
  0xfc   : > { %405 = vmatpush.msra.mxu0 %v1867_v63  ;;  %425 = vmatpush.msra.mxu1 %v1872_v0 }
  0xfd   : > { %465 = vmatpush.msra.mxu3 %v1880_v1  ;;  %443 = vmatpush.msra.mxu2 %v1937_v14 }
  0xfe   : > { %406 = vmatpush.msra.mxu0 %v1891_v3  ;;  %426 = vmatpush.msra.mxu1 %v1896_v4 }
  0xff   : > { %466 = vmatpush.msra.mxu3 %v1904_v5  ;;  %444 = vmatpush.msra.mxu2 %v1946_v15 }
 0x100   : > { %407 = vmatpush.msra.mxu0 %v1915_v7  ;;  %427 = vmatpush.msra.mxu1 %v1920_v8 }
 0x101   : > { %467 = vmatpush.msra.mxu3 %v1928_v13  ;;  %408 = vmatmul.f32.vlgmr.msra.gmra.mxu0 %v1259_v18 }
 0x102   : > { %428 = vmatmul.f32.vlgmr.msra.gmra.mxu1 %v1259_v18  ;;  %468 = vmatmul.f32.vlgmr.msra.gmra.mxu3 %v1259_v18 }
 0x103   : > { %614 = vmatpush.msrb.mxu0 %v1584_v9  ;;  %634 = vmatpush.msrb.mxu1 %v1589_v10  ;;  %v330_v9 = vld [vmem:[%s2185_s3 + $0x10] sm:$0xff]  ;;  %v325_v10 = vld [vmem:[%s2030_s11 + $0x8] sm:$0xff] }
 0x104   : > { %674 = vmatpush.msrb.mxu3 %v1594_v11  ;;  %445 = vmatpush.msra.mxu2 %v1953_v16 }
 0x105   : > { %615 = vmatpush.msrb.mxu0 %v1601_v12  ;;  %635 = vmatpush.msrb.mxu1 %v1606_v19 }
 0x106   : > { %675 = vmatpush.msrb.mxu3 %v1611_v20  ;;  %446 = vmatpush.msra.mxu2 %v1962_v17 }
 0x107   : > { %616 = vmatpush.msrb.mxu0 %v1617_v21  ;;  %636 = vmatpush.msrb.mxu1 %v1622_v22 }
 0x108   : > { %676 = vmatpush.msrb.mxu3 %v1629_v23  ;;  %447 = vmatpush.msra.mxu2 %v330_v9  ;;  %v327_v23 = vld [vmem:[%s2030_s11 + $0x18] sm:$0xff] }
 0x109   : > { %617 = vmatpush.msrb.mxu0 %v1635_v24  ;;  %637 = vmatpush.msrb.mxu1 %v1640_v25 }
 0x10a   : > { %677 = vmatpush.msrb.mxu3 %v1647_v26  ;;  %448 = vmatmul.f32.vlgmr.msra.gmra.mxu2 %v1259_v18  ;;  %v324_v18 = vld [vmem:[%s2030_s11] sm:$0xff] }
 0x10b   : > { %618 = vmatpush.msrb.mxu0 %v1653_v27  ;;  %638 = vmatpush.msrb.mxu1 %v1658_v28 }
 0x10c   : > { %654 = vmatpush.msrb.mxu2 %v1681_v32  ;;  %678 = vmatpush.msrb.mxu3 %v1665_v29 }
 0x10d   : > { %619 = vmatpush.msrb.mxu0 %v1671_v30  ;;  %639 = vmatpush.msrb.mxu1 %v1676_v31  ;;  %v326_v30 = vld [vmem:[%s2030_s11 + $0x10] sm:$0xff] }
 0x10e   : > { %655 = vmatpush.msrb.mxu2 %v1693_v34  ;;  %679 = vmatpush.msrb.mxu3 %v1688_v33 }
 0x10f   : > { %620 = vmatpush.msrb.mxu0 %v1699_v35  ;;  %640 = vmatpush.msrb.mxu1 %v1704_v36 }
 0x110   : > { %656 = vmatpush.msrb.mxu2 %v1717_v38  ;;  %680 = vmatpush.msrb.mxu3 %v1712_v37 }
 0x111   : > { %621 = vmatpush.msrb.mxu0 %v1723_v39  ;;  %641 = vmatpush.msrb.mxu1 %v1728_v40 }
 0x112   : > { %657 = vmatpush.msrb.mxu2 %v1741_v42  ;;  %681 = vmatpush.msrb.mxu3 %v1736_v41 }
 0x113   : > { %622 = vmatpush.msrb.mxu0 %v1747_v43  ;;  %642 = vmatpush.msrb.mxu1 %v1752_v44 }
 0x114   : > { %658 = vmatpush.msrb.mxu2 %v1765_v46  ;;  %682 = vmatpush.msrb.mxu3 %v1760_v45 }
 0x115   : > { %623 = vmatpush.msrb.mxu0 %v1771_v47  ;;  %643 = vmatpush.msrb.mxu1 %v1776_v48 }
 0x116   : > { %659 = vmatpush.msrb.mxu2 %v1789_v50  ;;  %683 = vmatpush.msrb.mxu3 %v1784_v49 }
 0x117   : > { %624 = vmatpush.msrb.mxu0 %v1795_v51  ;;  %644 = vmatpush.msrb.mxu1 %v1800_v52 }
 0x118   : > { %660 = vmatpush.msrb.mxu2 %v1813_v54  ;;  %684 = vmatpush.msrb.mxu3 %v1808_v53 }
 0x119   : > { %625 = vmatpush.msrb.mxu0 %v1819_v55  ;;  %645 = vmatpush.msrb.mxu1 %v1824_v56 }
 0x11a   : > { %661 = vmatpush.msrb.mxu2 %v1837_v58  ;;  %685 = vmatpush.msrb.mxu3 %v1832_v57 }
 0x11b   : > { %626 = vmatpush.msrb.mxu0 %v1843_v59  ;;  %646 = vmatpush.msrb.mxu1 %v1848_v60 }
 0x11c   : > { %662 = vmatpush.msrb.mxu2 %v1861_v62  ;;  %686 = vmatpush.msrb.mxu3 %v1856_v61  ;;  %v2192_v61 = vld [vmem:[#allocation6_spill] sm:$0xff] }
 0x11d   : > { %627 = vmatpush.msrb.mxu0 %v1867_v63  ;;  %647 = vmatpush.msrb.mxu1 %v1872_v0 }
 0x11e   : > { %663 = vmatpush.msrb.mxu2 %v1885_v2  ;;  %687 = vmatpush.msrb.mxu3 %v1880_v1 }
 0x11f   : > { %628 = vmatpush.msrb.mxu0 %v1891_v3  ;;  %648 = vmatpush.msrb.mxu1 %v1896_v4 }
 0x120   : > { %664 = vmatpush.msrb.mxu2 %v1909_v6  ;;  %688 = vmatpush.msrb.mxu3 %v1904_v5 }
 0x121   : > { %629 = vmatpush.msrb.mxu0 %v1915_v7  ;;  %649 = vmatpush.msrb.mxu1 %v1920_v8  ;;  %v1049_v8 = vld [vmem:[%s2030_s11 + $0x20] sm:$0xff] }
 0x122   : > { %665 = vmatpush.msrb.mxu2 %v1937_v14  ;;  %689 = vmatpush.msrb.mxu3 %v1928_v13  ;;  %v1050_v13 = vld [vmem:[%s2030_s11 + $0x28] sm:$0xff] }
 0x124   : > { %666 = vmatpush.msrb.mxu2 %v1946_v15 }
 0x126   : > { %667 = vmatpush.msrb.mxu2 %v1953_v16 }
 0x128   : > { %668 = vmatpush.msrb.mxu2 %v1962_v17 }
 0x12a   : > { %669 = vmatpush.msrb.mxu2 %v330_v9 }
 0x17e   : > { %v409_v11 = vpop.f32.mrf.mxu0 }
 0x17f   : > { %v472_v12 = vadd.f32 %v409_v11, %v324_v18  ;;  %v429_v19 = vpop.f32.mrf.mxu1  ;;  %v1052_v11 = vld [vmem:[%s2030_s11 + $0x38] sm:$0xff] }
 0x180   : > { %v473_v20 = vadd.f32 %v429_v19, %v325_v10 }
 0x181   : > { %v1043_v21 = vmul.f32 -1.442695, %v472_v12 }
 0x182   : > { %v1044_v22 = vmul.f32 -1.442695, %v473_v20 }
 0x183   : > { %1154 = vpow2.f32 %v1043_v21 }
 0x184   : > { %1156 = vpow2.f32 %v1044_v22 }
 0x185   : > { %v469_v17 = vpop.f32.mrf.mxu3 }
 0x186   : > { %v475_v24 = vadd.f32 %v469_v17, %v327_v23 }
 0x188   : > { %v1045_v25 = vmul.f32 -1.442695, %v475_v24  ;;  %v1051_v24 = vld [vmem:[%s2030_s11 + $0x30] sm:$0xff] }
 0x189   : > { %v1155_v26 = vpop.eup %1154 }
 0x18a   : > { %v1157_v27 = vpop.eup %1156  ;;  %v479_v28 = vadd.f32 1.0, %v1155_v26  ;;  %1158 = vpow2.f32 %v1045_v25 }
 0x18b   : > { %v498_v29 = vadd.f32 1.0, %v1157_v27 }
 0x18c   : > { %1160 = vrcp.f32 %v479_v28  ;;  %v491_v41 = vand.u32 2147483648, %v479_v28  ;;  %v489_v44 = vand.u32 2147483647, %v479_v28  ;;  %vm485_vm2 = vweird.f32 %v479_v28 }
 0x18d   : > { %1162 = vrcp.f32 %v498_v29  ;;  %v449_v31 = vpop.f32.mrf.mxu2  ;;  %v510_v42 = vand.u32 2147483648, %v498_v29  ;;  %v508_v46 = vand.u32 2147483647, %v498_v29  ;;  %vm504_vm3 = vweird.f32 %v498_v29 }
 0x18e   : > { %v474_v33 = vadd.f32 %v449_v31, %v326_v30  ;;  %v492_v51 = vor.u32 1.1754944e-38, %v491_v41  ;;  %vm490_vm6 = vcmp.eq.f32.partialorder %v489_v44, 8.507059e+37 }
 0x18f   : > { %v511_v53 = vor.u32 1.1754944e-38, %v510_v42  ;;  %vm509_vm7 = vcmp.eq.f32.partialorder %v508_v46, 8.507059e+37 }
 0x190   : > { %v1159_v32 = vpop.eup %1158 }
 0x191   : > { %v518_v34 = vadd.f32 1.0, %v1159_v32 }
 0x192   : > { %v1161_v35 = vpop.eup %1160 }
 0x193   : > { %v1163_v36 = vpop.eup %1162  ;;  %v481_v37 = vmul.f32 %v1161_v35, %v479_v28  ;;  %1164 = vrcp.f32 %v518_v34  ;;  %vm486_vm0 = vweird.f32 %v1161_v35  ;;  %v530_v1 = vand.u32 2147483648, %v518_v34 }
 0x194   : > { %v500_v38 = vmul.f32 %v1163_v36, %v498_v29  ;;  %1166 = vtanh.f32 %v474_v33  ;;  %vm505_vm1 = vweird.f32 %v1163_v36  ;;  %vm487_vm4 = vmor %vm485_vm2, %vm486_vm0  ;;  %vm524_vm9 = vweird.f32 %v518_v34 }
 0x195   : > { %v482_v39 = vsub.f32 1.0, %v481_v37  ;;  %vm506_vm5 = vmor %vm504_vm3, %vm505_vm1  ;;  %v528_v2 = vand.u32 2147483647, %v518_v34  ;;  %v531_v4 = vor.u32 1.1754944e-38, %v530_v1  ;;  %v1265_v1 = vmov (%p314_p0), 0  }
 0x196   : > { %v501_v40 = vsub.f32 1.0, %v500_v38  ;;  %1197 = vset.pattern.permute.xlu1 (%p314_p0), %v1265_v1  ;;  %1186 = vset.pattern.permute.xlu0 (%p314_p0), %v1265_v1 }
 0x197   : > { %v483_v43 = vmul.f32 %v1161_v35, %v482_v39  ;;  %vm529_vm11 = vcmp.eq.f32.partialorder %v528_v2, 8.507059e+37  ;;  %v870_v2 = vld [vmem:[%s2186_s5 + $0x70] sm:$0xff] (%p314_p0) }
 0x198   : > { %v502_v45 = vmul.f32 %v1163_v36, %v501_v40 }
 0x199   : > { %v1165_v47 = vpop.eup %1164  ;;  %v484_v48 = vadd.f32 %v1161_v35, %v483_v43 }
 0x19a   : > { %v1167_v49 = vpop.eup %1166  ;;  %v520_v50 = vmul.f32 %v1165_v47, %v518_v34  ;;  %v503_v52 = vadd.f32 %v1163_v36, %v502_v45  ;;  %vm525_vm8 = vweird.f32 %v1165_v47 }
 0x19b   : > { %v488_v54 = vsel %vm487_vm4, %v1161_v35, %v484_v48  ;;  %vm526_vm10 = vmor %vm524_vm9, %vm525_vm8 }
 0x19c   : > { %v521_v55 = vsub.f32 1.0, %v520_v50  ;;  %v493_v56 = vsel %vm490_vm6, %v492_v51, %v488_v54  ;;  %v507_v57 = vsel %vm506_vm5, %v1163_v36, %v503_v52 }
 0x19d   : > { %v512_v58 = vsel %vm509_vm7, %v511_v53, %v507_v57  ;;  %v535_v59 = vmul.f32 %v1167_v49, %v493_v56 }
 0x19e   : > { %v522_v60 = vmul.f32 %v1165_v47, %v521_v55  ;;  %v534_v62 = vmul.f32 %v2192_v61, %v512_v58 }
 0x1a0   : > { %v2037_v63 = vadd.f32 %v535_v59, %v534_v62  ;;  %v523_v0 = vadd.f32 %v1165_v47, %v522_v60 }
 0x1a2   : > { %1168 = vtanh.f32 %v2037_v63  ;;  %v527_v3 = vsel %vm526_vm10, %v1165_v47, %v523_v0  ;;  %v871_v0 = vld [vmem:[%s2186_s5 + $0x78] sm:$0xff] (%p314_p0) }
 0x1a3   : > { %v532_v6 = vsel %vm529_vm11, %v531_v4, %v527_v3  ;;  %v1266_v3 = vmov (%p314_p0), 0.0   ;;  %1081 = vmatpush.msra.mxu2 (%p314_p0), %v871_v0  ;;  %1082 = vmatpush.msra.mxu3 (%p314_p0), %v871_v0 }
 0x1a4   :  { %876 = vmatpush.msra.mxu0 (%p314_p0), %v871_v0  ;;  %1080 = vmatpush.msra.mxu1 (%p314_p0), %v871_v0 }
 0x1a5   :  { %1084 = vmatpush.msra.mxu2 (%p314_p0), %v870_v2  ;;  %1085 = vmatpush.msra.mxu3 (%p314_p0), %v870_v2 }
 0x1a6   :  { %877 = vmatpush.msra.mxu0 (%p314_p0), %v870_v2  ;;  %1083 = vmatpush.msra.mxu1 (%p314_p0), %v870_v2 }
 0x1a8   : > { %v1169_v5 = vpop.eup %1168 }
 0x1a9   : > { %v538_v7 = vmul.f32 %v1169_v5, %v532_v6 }
 0x1ab   : > { %541 = vst [vmem:[%s2041_s13] sm:$0xff] %v538_v7  ;;  %630 = vmatmul.f32.vlgmr.msrb.gmra.mxu0 %v538_v7  ;;  %650 = vmatmul.f32.vlgmr.msrb.gmra.mxu1 %v538_v7 }
 0x1ac   : > { %670 = vmatmul.f32.vlgmr.msrb.gmra.mxu2 %v538_v7  ;;  %690 = vmatmul.f32.vlgmr.msrb.gmra.mxu3 %v538_v7 }
 0x228   : > { %v631_v14 = vpop.f32.mrf.mxu0  ;;  %v651_v15 = vpop.f32.mrf.mxu1 }
 0x229   : > { %v694_v16 = vadd.f32 %v1049_v8, %v631_v14  ;;  %v695_v9 = vadd.f32 %v1050_v13, %v651_v15  ;;  %v869_v14 = vld [vmem:[%s2186_s5 + $0x68] sm:$0xff] (%p314_p0)  ;;  %v868_v15 = vld [vmem:[%s2186_s5 + $0x60] sm:$0xff] (%p314_p0) }
 0x22a   :  { %1087 = vmatpush.msra.mxu2 (%p314_p0), %v869_v14  ;;  %1088 = vmatpush.msra.mxu3 (%p314_p0), %v869_v14 }
 0x22b   : > { %v1053_v18 = vmul.f32 -1.442695, %v694_v16  ;;  %v1054_v10 = vmul.f32 -1.442695, %v695_v9  ;;  %878 = vmatpush.msra.mxu0 (%p314_p0), %v869_v14  ;;  %1086 = vmatpush.msra.mxu1 (%p314_p0), %v869_v14 }
 0x22c   :  { %1090 = vmatpush.msra.mxu2 (%p314_p0), %v868_v15  ;;  %1091 = vmatpush.msra.mxu3 (%p314_p0), %v868_v15 }
 0x22d   : > { %1170 = vpow2.f32 %v1053_v18  ;;  %879 = vmatpush.msra.mxu0 (%p314_p0), %v868_v15  ;;  %1089 = vmatpush.msra.mxu1 (%p314_p0), %v868_v15 }
 0x22e   : > { %1172 = vpow2.f32 %v1054_v10 }
 0x22f   : > { %v691_v12 = vpop.f32.mrf.mxu3  ;;  %v671_v25 = vpop.f32.mrf.mxu2 }
 0x230   : > { %v697_v19 = vadd.f32 %v1052_v11, %v691_v12  ;;  %v696_v29 = vadd.f32 %v1051_v24, %v671_v25  ;;  %v867_v11 = vld [vmem:[%s2186_s5 + $0x58] sm:$0xff] (%p314_p0)  ;;  %v861_v24 = vld [vmem:[%s2186_s5 + $0x28] sm:$0xff] (%p314_p0)  ;;  %v860_v25 = vld [vmem:[%s2186_s5 + $0x20] sm:$0xff] (%p314_p0) }
 0x231   :  { %1093 = vmatpush.msra.mxu2 (%p314_p0), %v867_v11  ;;  %1094 = vmatpush.msra.mxu3 (%p314_p0), %v867_v11 }
 0x232   : > { %v1055_v20 = vmul.f32 -1.442695, %v697_v19  ;;  %880 = vmatpush.msra.mxu0 (%p314_p0), %v867_v11  ;;  %1092 = vmatpush.msra.mxu1 (%p314_p0), %v867_v11 }
 0x233   : > { %v1171_v21 = vpop.eup %1170 }
 0x234   : > { %v1173_v22 = vpop.eup %1172  ;;  %v701_v23 = vadd.f32 1.0, %v1171_v21  ;;  %1174 = vpow2.f32 %v1055_v20  ;;  %v866_v20 = vld [vmem:[%s2186_s5 + $0x50] sm:$0xff] (%p314_p0)  ;;  %v865_v21 = vld [vmem:[%s2186_s5 + $0x48] sm:$0xff] (%p314_p0) }
 0x235   : > { %v720_v17 = vadd.f32 1.0, %v1173_v22  ;;  %1096 = vmatpush.msra.mxu2 (%p314_p0), %v866_v20  ;;  %1097 = vmatpush.msra.mxu3 (%p314_p0), %v866_v20  ;;  %v864_v22 = vld [vmem:[%s2186_s5 + $0x40] sm:$0xff] (%p314_p0) }
 0x236   : > { %1176 = vrcp.f32 %v701_v23  ;;  %v713_v35 = vand.u32 2147483648, %v701_v23  ;;  %v711_v38 = vand.u32 2147483647, %v701_v23  ;;  %vm707_vm14 = vweird.f32 %v701_v23  ;;  %881 = vmatpush.msra.mxu0 (%p314_p0), %v866_v20  ;;  %1095 = vmatpush.msra.mxu1 (%p314_p0), %v866_v20 }
 0x237   : > { %1178 = vrcp.f32 %v720_v17  ;;  %v732_v36 = vand.u32 2147483648, %v720_v17  ;;  %v730_v40 = vand.u32 2147483647, %v720_v17  ;;  %vm726_vm15 = vweird.f32 %v720_v17  ;;  %1099 = vmatpush.msra.mxu2 (%p314_p0), %v865_v21  ;;  %1100 = vmatpush.msra.mxu3 (%p314_p0), %v865_v21 }
 0x238   : > { %v714_v43 = vor.u32 1.1754944e-38, %v713_v35  ;;  %vm712_vm2 = vcmp.eq.f32.partialorder %v711_v38, 8.507059e+37  ;;  %882 = vmatpush.msra.mxu0 (%p314_p0), %v865_v21  ;;  %1098 = vmatpush.msra.mxu1 (%p314_p0), %v865_v21 }
 0x239   : > { %v733_v46 = vor.u32 1.1754944e-38, %v732_v36  ;;  %vm731_vm3 = vcmp.eq.f32.partialorder %v730_v40, 8.507059e+37  ;;  %1102 = vmatpush.msra.mxu2 (%p314_p0), %v864_v22  ;;  %1103 = vmatpush.msra.mxu3 (%p314_p0), %v864_v22 }
 0x23a   : > { %v1175_v26 = vpop.eup %1174  ;;  %883 = vmatpush.msra.mxu0 (%p314_p0), %v864_v22  ;;  %1101 = vmatpush.msra.mxu1 (%p314_p0), %v864_v22 }
 0x23b   : > { %v740_v27 = vadd.f32 1.0, %v1175_v26  ;;  %v859_v26 = vld [vmem:[%s2186_s5 + $0x18] sm:$0xff] (%p314_p0) }
 0x23c   : > { %v1177_v28 = vpop.eup %1176 }
 0x23d   : > { %v1179_v30 = vpop.eup %1178  ;;  %v703_v31 = vmul.f32 %v1177_v28, %v701_v23  ;;  %1180 = vrcp.f32 %v740_v27  ;;  %vm708_vm12 = vweird.f32 %v1177_v28  ;;  %v752_v57 = vand.u32 2147483648, %v740_v27  ;;  %v863_v23 = vld [vmem:[%s2186_s5 + $0x38] sm:$0xff] (%p314_p0) }
 0x23e   : > { %v722_v32 = vmul.f32 %v1179_v30, %v720_v17  ;;  %1182 = vtanh.f32 %v696_v29  ;;  %vm727_vm13 = vweird.f32 %v1179_v30  ;;  %vm709_vm0 = vmor %vm707_vm14, %vm708_vm12  ;;  %vm746_vm5 = vweird.f32 %v740_v27  ;;  %1105 = vmatpush.msra.mxu2 (%p314_p0), %v863_v23  ;;  %1106 = vmatpush.msra.mxu3 (%p314_p0), %v863_v23  ;;  %v856_v29 = vld [vmem:[%s2186_s5] sm:$0xff] (%p314_p0) }
 0x23f   : > { %v704_v33 = vsub.f32 1.0, %v703_v31  ;;  %vm728_vm1 = vmor %vm726_vm15, %vm727_vm13  ;;  %v750_v58 = vand.u32 2147483647, %v740_v27  ;;  %v753_v60 = vor.u32 1.1754944e-38, %v752_v57  ;;  %884 = vmatpush.msra.mxu0 (%p314_p0), %v863_v23  ;;  %1104 = vmatpush.msra.mxu1 (%p314_p0), %v863_v23 }
 0x240   : > { %v723_v34 = vsub.f32 1.0, %v722_v32 }
 0x241   : > { %v705_v37 = vmul.f32 %v1177_v28, %v704_v33  ;;  %vm751_vm7 = vcmp.eq.f32.partialorder %v750_v58, 8.507059e+37  ;;  %v1208_v58 = vld [vmem:[%s2187_s6] ss:$0 sm:$0xff] (%p314_p0) }
 0x242   : > { %v724_v39 = vmul.f32 %v1179_v30, %v723_v34 }
 0x243   : > { %v1181_v41 = vpop.eup %1180  ;;  %v706_v42 = vadd.f32 %v1177_v28, %v705_v37 }
 0x244   : > { %v725_v44 = vadd.f32 %v1179_v30, %v724_v39  ;;  %v742_v45 = vmul.f32 %v1181_v41, %v740_v27  ;;  %v1183_v48 = vpop.eup %1182  ;;  %vm747_vm4 = vweird.f32 %v1181_v41  ;;  %v858_v27 = vld [vmem:[%s2186_s5 + $0x10] sm:$0xff] (%p314_p0) }
 0x245   : > { %v710_v47 = vsel %vm709_vm0, %v1177_v28, %v706_v42  ;;  %vm748_vm6 = vmor %vm746_vm5, %vm747_vm4  ;;  %v857_v28 = vld [vmem:[%s2186_s5 + $0x8] sm:$0xff] (%p314_p0) }
 0x246   : > { %v715_v49 = vsel %vm712_vm2, %v714_v43, %v710_v47  ;;  %v729_v50 = vsel %vm728_vm1, %v1179_v30, %v725_v44  ;;  %v743_v51 = vsub.f32 1.0, %v742_v45 }
 0x247   : > { %v734_v52 = vsel %vm731_vm3, %v733_v46, %v729_v50  ;;  %v757_v53 = vmul.f32 %v1183_v48, %v715_v49 }
 0x248   : > { %v756_v54 = vmul.f32 %v734_v52, %v2037_v63  ;;  %v744_v55 = vmul.f32 %v1181_v41, %v743_v51  ;;  %v775_v63 = vld [vmem:[%s2184_s0] sm:$0xff] (%p314_p0) }
 0x249   :  { %vm1064_vm8 = vcmp.gt.s32.totalorder (%p314_p0), %v775_v63, 5  ;;  %vm1066_vm9 = vcmp.gt.s32.totalorder (%p314_p0), %v775_v63, 7  ;;  %vm1063_vm10 = vcmp.gt.s32.totalorder (%p314_p0), %v775_v63, 4  ;;  %vm1065_vm11 = vcmp.gt.s32.totalorder (%p314_p0), %v775_v63, 6 }
 0x24a   : > { %v758_v17 = vadd.f32 %v757_v53, %v756_v54   ;;  %v745_v56 = vadd.f32 %v1181_v41, %v744_v55  ;;  %v1072_v4 = vsel (%p314_p0), %vm1064_vm8, 1.0, %v1266_v3  ;;  %v1074_v5 = vsel (%p314_p0), %vm1066_vm9, 1.0, %v1266_v3 }
 0x24b   :  { %v1071_v6 = vsel (%p314_p0), %vm1063_vm10, 1.0, %v1266_v3  ;;  %v1073_v7 = vsel (%p314_p0), %vm1065_vm11, 1.0, %v1266_v3  ;;  %v1198_v8 = vpack.i.bf16 (%p314_p0), %v1074_v5, %v1072_v4  ;;  %vm1060_vm12 = vcmp.gt.s32.totalorder (%p314_p0), %v775_v63, 1 }
 0x24c   : > { %1184 = vtanh.f32 %v758_v17  ;;  %v749_v59 = vsel %vm748_vm6, %v1181_v41, %v745_v56  ;;  %v1187_v13 = vpack.i.bf16 (%p314_p0), %v1073_v7, %v1071_v6  ;;  %vm1062_vm13 = vcmp.gt.s32.totalorder (%p314_p0), %v775_v63, 3  ;;  %v862_v17 = vld [vmem:[%s2186_s5 + $0x30] sm:$0xff] (%p314_p0) }
 0x24d   : > { %v754_v62 = vsel %vm751_vm7, %v753_v60, %v749_v59  ;;  %vm1059_vm14 = vcmp.gt.s32.totalorder (%p314_p0), %v775_v63, 0  ;;  %vm1061_vm15 = vcmp.gt.s32.totalorder (%p314_p0), %v775_v63, 2  ;;  %1199 = vperm.xlu1 (%p314_p0), %1197, %v1198_v8   ;;  %v1068_v16 = vsel (%p314_p0), %vm1060_vm12, 1.0, %v1266_v3  ;;  %1108 = vmatpush.msra.mxu2 (%p314_p0), %v862_v17 }
 0x24e   :  { %1188 = vperm.xlu0 (%p314_p0), %1186, %v1187_v13   ;;  %v1070_v9 = vsel (%p314_p0), %vm1062_vm13, 1.0, %v1266_v3  ;;  %v1069_v10 = vsel (%p314_p0), %vm1061_vm15, 1.0, %v1266_v3  ;;  %1109 = vmatpush.msra.mxu3 (%p314_p0), %v862_v17 }
 0x24f   :  { %v1203_v12 = vpack.i.bf16 (%p314_p0), %v1070_v9, %v1068_v16  ;;  %1111 = vmatpush.msra.mxu2 (%p314_p0), %v861_v24  ;;  %885 = vmatpush.msra.mxu0 (%p314_p0), %v862_v17 }
 0x250   :  { %1112 = vmatpush.msra.mxu3 (%p314_p0), %v861_v24  ;;  %1107 = vmatpush.msra.mxu1 (%p314_p0), %v862_v17 }
 0x251   :  { %316 = sbr.rel (!%p314_p0) target bundleno = 225 (0xe1), region = 63  ;;  %1114 = vmatpush.msra.mxu2 (%p314_p0), %v860_v25  ;;  %886 = vmatpush.msra.mxu0 (%p314_p0), %v861_v24 }
 0x252   : > { %v1185_v61 = vpop.eup %1184  ;;  %1115 = vmatpush.msra.mxu3 (%p314_p0), %v860_v25  ;;  %1110 = vmatpush.msra.mxu1 (%p314_p0), %v861_v24 }
 0x253   : > { %v760_v18 = vmul.f32 %v1185_v61, %v754_v62   ;;  %1117 = vmatpush.msra.mxu2 (%p314_p0), %v859_v26  ;;  %887 = vmatpush.msra.mxu0 (%p314_p0), %v860_v25 }
 0x254   :  { %1118 = vmatpush.msra.mxu3 (%p314_p0), %v859_v26  ;;  %1113 = vmatpush.msra.mxu1 (%p314_p0), %v860_v25 }
 0x255   : > { %1058 = vst [vmem:[%s2041_s13 + $0x8] sm:$0xff] %v760_v18  ;;  %v1067_v18 = vsel (%p314_p0), %vm1059_vm14, 1.0, %v1266_v3  ;;  %1204 = vperm.xlu1 (%p314_p0), %1197, %v1203_v12   ;;  %1120 = vmatpush.msra.mxu2 (%p314_p0), %v858_v27 }
 0x256   :  { %v1192_v19 = vpack.i.bf16 %v1069_v10, %v1067_v18  ;;  %1121 = vmatpush.msra.mxu3 %v858_v27  ;;  %888 = vmatpush.msra.mxu0 %v859_v26 }
 0x257   :  { %1116 = vmatpush.msra.mxu1 %v859_v26  ;;  %1123 = vmatpush.msra.mxu2 %v857_v28 }
 0x258   :  { %1193 = vperm.xlu0 %1186, %v1192_v19   ;;  %889 = vmatpush.msra.mxu0 %v858_v27 }
 0x259   :  { %1119 = vmatpush.msra.mxu1 %v858_v27  ;;  %1124 = vmatpush.msra.mxu3 %v857_v28 }
 0x25a   :  { %890 = vmatpush.msra.mxu0 %v857_v28  ;;  %1126 = vmatpush.msra.mxu2 %v856_v29 }
 0x25b   :  { %1122 = vmatpush.msra.mxu1 %v857_v28  ;;  %1127 = vmatpush.msra.mxu3 %v856_v29 }
 0x25c   :  { %891 = vmatpush.msra.mxu0 %v856_v29  ;;  %v804_v31 = vld [vmem:[#allocation5 + $0x20] sm:$0xff]  ;;  %v806_v32 = vld [vmem:[#allocation5 + $0x30] sm:$0xff]  ;;  %v805_v40 = vld [vmem:[#allocation5 + $0x28] sm:$0xff] }
 0x25d   :  { %1125 = vmatpush.msra.mxu1 %v856_v29  ;;  %v807_v41 = vld [vmem:[#allocation5 + $0x38] sm:$0xff]  ;;  %v800_v43 = vld [vmem:[#allocation5] sm:$0xff]  ;;  %v802_v44 = vld [vmem:[#allocation5 + $0x10] sm:$0xff] }
 0x25e   :  { %v801_v54 = vld [vmem:[#allocation5 + $0x8] sm:$0xff]  ;;  %v803_v55 = vld [vmem:[#allocation5 + $0x18] sm:$0xff] }
 0x2bf   :  { %v1200_v35 = vpop.permute.xlu1 %1199 }
 0x2c0   :  { %v1189_v30 = vpop.permute.xlu0 %1188  ;;  %v1202_v38 = vunpack.i.h.bf16 %v1200_v35  ;;  %v1201_v39 = vunpack.i.l.bf16 %v1200_v35 }
 0x2c1   :  { %v1191_v33 = vunpack.i.h.bf16 %v1189_v30  ;;  %v1190_v34 = vunpack.i.l.bf16 %v1189_v30 }
 0x2c2   :  { %v853_v47 = vmul.f32 %v1201_v39, %v805_v40  ;;  %v855_v48 = vmul.f32 %v1202_v38, %v807_v41 }
 0x2c3   :  { %v852_v36 = vmul.f32 %v1190_v34, %v804_v31  ;;  %v854_v37 = vmul.f32 %v1191_v33, %v806_v32 }
 0x2c5   :  { %904 = vmatmul.f32.vlgmr.msra.gmra.mxu2 %v852_v36  ;;  %910 = vmatmul.f32.vlgmr.msra.gmra.mxu3 %v854_v37 }
 0x2c7   :  { %v1205_v51 = vpop.permute.xlu1 %1204 }
 0x2c8   :  { %v1207_v52 = vunpack.i.h.bf16 %v1205_v51  ;;  %v1206_v53 = vunpack.i.l.bf16 %v1205_v51 }
 0x2ca   :  { %v1194_v42 = vpop.permute.xlu0 %1193  ;;  %v849_v56 = vmul.f32 %v1206_v53, %v801_v54  ;;  %v851_v57 = vmul.f32 %v1207_v52, %v803_v55 }
 0x2cb   :  { %v1196_v45 = vunpack.i.h.bf16 %v1194_v42  ;;  %v1195_v46 = vunpack.i.l.bf16 %v1194_v42 }
 0x2cd   :  { %v848_v49 = vmul.f32 %v1195_v46, %v800_v43  ;;  %v850_v50 = vmul.f32 %v1196_v45, %v802_v44  ;;  %907 = vmatmul.f32.gmra.mxu2 %v853_v47  ;;  %913 = vmatmul.f32.gmra.mxu3 %v855_v48 }
 0x2cf   :  { %892 = vmatmul.f32.vlgmr.msra.gmra.mxu0 %v848_v49  ;;  %898 = vmatmul.f32.vlgmr.msra.gmra.mxu1 %v850_v50 }
 0x2d7   :  { %895 = vmatmul.f32.gmra.mxu0 %v849_v56  ;;  %901 = vmatmul.f32.gmra.mxu1 %v851_v57 }
 0x348   :  { %v905_v3 = vpop.f32.mrf.mxu2  ;;  %v911_v5 = vpop.f32.mrf.mxu3 }
 0x349   :  { %v2123_v4 = vadd.f32 %v1208_v58, %v905_v3  ;;  %v2126_v6 = vadd.f32 %v1208_v58, %v911_v5 }
 0x34c   :  { %v893_v59 = vpop.f32.mrf.mxu0  ;;  %v899_v60 = vpop.f32.mrf.mxu1 }
 0x34d   :  { %v2111_v61 = vadd.f32 %v1208_v58, %v893_v59  ;;  %v2113_v62 = vadd.f32 %v1208_v58, %v899_v60 }
 0x34f   :  { %921 = vmax.xlane.f32.xlu0 %v2113_v62  ;;  %917 = vmax.xlane.f32.xlu2 %v2111_v61 }
 0x350   :  { %v908_v7 = vpop.f32.mrf.mxu2  ;;  %v914_v13 = vpop.f32.mrf.mxu3 }
 0x351   :  { %v2129_v8 = vadd.f32 %v1208_v58, %v908_v7  ;;  %v2132_v14 = vadd.f32 %v1208_v58, %v914_v13 }
 0x354   :  { %v896_v63 = vpop.f32.mrf.mxu0  ;;  %v902_v0 = vpop.f32.mrf.mxu1 }
 0x355   :  { %v2117_v1 = vadd.f32 %v1208_v58, %v896_v63  ;;  %v2119_v2 = vadd.f32 %v1208_v58, %v902_v0 }
 0x357   :  { %923 = vmax.xlane.f32.xlu1 %v2119_v2  ;;  %919 = vmax.xlane.f32.xlu2 %v2117_v1 }
 0x35f   :  { %925 = vmax.xlane.f32.xlu2 %v2123_v4 }
 0x367   :  { %929 = vmax.xlane.f32.xlu2 %v2126_v6 }
 0x36f   :  { %927 = vmax.xlane.f32.xlu2 %v2129_v8 }
 0x377   :  { %931 = vmax.xlane.f32.xlu2 %v2132_v14 }
 0x3c2   :  { %v922_v15 = vpop.xlane.xlu0 %921  ;;  %v918_v16 = vpop.xlane.xlu2 %917 }
 0x3c3   :  { %v935_v9 = vsub.f32 %v2113_v62, %v922_v15  ;;  %v933_v18 = vsub.f32 %v2111_v61, %v918_v16 }
 0x3c5   :  { %v945_v10 = vmul.f32 1.442695, %v935_v9  ;;  %v941_v11 = vmul.f32 1.442695, %v933_v18 }
 0x3c7   :  { %1209 = vpow2.f32 %v945_v10 }
 0x3c8   :  { %1211 = vpow2.f32 %v941_v11 }
 0x3ca   :  { %v924_v12 = vpop.xlane.xlu1 %923  ;;  %v2137_v19 = vpop.xlane.xlu2 %919 }
 0x3cb   :  { %v936_v20 = vsub.f32 %v2119_v2, %v924_v12  ;;  %v934_v27 = vsub.f32 %v2117_v1, %v2137_v19 }
 0x3cd   :  { %v1210_v21 = vpop.eup %1209  ;;  %v947_v22 = vmul.f32 1.442695, %v936_v20  ;;  %v943_v28 = vmul.f32 1.442695, %v934_v27 }
 0x3ce   :  { %v1212_v23 = vpop.eup %1211  ;;  %961 = vadd.xlane.f32.xlu0 %v1210_v21 }
 0x3cf   :  { %1213 = vpow2.f32 %v947_v22  ;;  %957 = vadd.xlane.f32.xlu2 %v1212_v23 }
 0x3d2   :  { %v926_v17 = vpop.xlane.xlu2 %925 }
 0x3d3   :  { %v937_v24 = vsub.f32 %v2123_v4, %v926_v17 }
 0x3d5   :  { %v1214_v25 = vpop.eup %1213  ;;  %v949_v26 = vmul.f32 1.442695, %v937_v24 }
 0x3d6   :  { %963 = vadd.xlane.f32.xlu1 %v1214_v25 }
 0x3d7   :  { %1215 = vpow2.f32 %v949_v26 }
 0x3d8   :  { %1217 = vpow2.f32 %v943_v28 }
 0x3da   :  { %v930_v29 = vpop.xlane.xlu2 %929 }
 0x3db   :  { %v939_v30 = vsub.f32 %v2126_v6, %v930_v29 }
 0x3dd   :  { %v1216_v31 = vpop.eup %1215  ;;  %v953_v32 = vmul.f32 1.442695, %v939_v30 }
 0x3de   :  { %965 = vadd.xlane.f32.xlu2 %v1216_v31  ;;  %v1218_v35 = vpop.eup %1217 }
 0x3df   :  { %1219 = vpow2.f32 %v953_v32 }
 0x3e2   :  { %v2144_v33 = vpop.xlane.xlu2 %927 }
 0x3e3   :  { %v938_v34 = vsub.f32 %v2129_v8, %v2144_v33 }
 0x3e5   :  { %v1220_v36 = vpop.eup %1219  ;;  %v951_v37 = vmul.f32 1.442695, %v938_v34 }
 0x3e6   :  { %959 = vadd.xlane.f32.xlu2 %v1218_v35  ;;  %969 = vadd.xlane.f32.xlu1 %v1220_v36 }
 0x3e7   :  { %1221 = vpow2.f32 %v951_v37 }
 0x3ea   :  { %v932_v38 = vpop.xlane.xlu2 %931 }
 0x3eb   :  { %v940_v39 = vsub.f32 %v2132_v14, %v932_v38 }
 0x3ed   :  { %v1222_v40 = vpop.eup %1221  ;;  %v955_v41 = vmul.f32 1.442695, %v940_v39 }
 0x3ee   :  { %967 = vadd.xlane.f32.xlu0 %v1222_v40 }
 0x3ef   :  { %1223 = vpow2.f32 %v955_v41 }
 0x3f5   :  { %v1224_v42 = vpop.eup %1223 }
 0x3f6   :  { %971 = vadd.xlane.f32.xlu2 %v1224_v42 }
 0x441   :  { %v962_v43 = vpop.xlane.xlu0 %961 }
 0x442   :  { %1225 = vlog2.f32 %v962_v43  ;;  %v958_v44 = vpop.xlane.xlu2 %957 }
 0x443   :  { %1227 = vlog2.f32 %v958_v44 }
 0x448   :  { %v1226_v45 = vpop.eup %1225 }
 0x449   :  { %v1228_v46 = vpop.eup %1227  ;;  %v978_v47 = vmul.f32 0.6931472, %v1226_v45  ;;  %v964_v48 = vpop.xlane.xlu1 %963 }
 0x44a   :  { %v974_v49 = vmul.f32 0.6931472, %v1228_v46  ;;  %1229 = vlog2.f32 %v964_v48 }
 0x44b   :  { %v991_v50 = vadd.f32 %v978_v47, %v922_v15 }
 0x44c   :  { %v989_v51 = vadd.f32 %v974_v49, %v918_v16 }
 0x44d   :  { %v999_v52 = vsub.f32 %v2113_v62, %v991_v50 }
 0x44e   :  { %v997_v53 = vsub.f32 %v2111_v61, %v989_v51 }
 0x44f   :  { %1007 = vst [vmem:[%s2188_s7 + $0x10] sm:$0xff] %v999_v52 }
 0x450   :  { %v1230_v54 = vpop.eup %1229  ;;  %1005 = vst [vmem:[%s2188_s7] sm:$0xff] %v997_v53 }
 0x451   :  { %v980_v55 = vmul.f32 0.6931472, %v1230_v54  ;;  %v966_v56 = vpop.xlane.xlu2 %965 }
 0x452   :  { %1231 = vlog2.f32 %v966_v56 }
 0x453   :  { %v992_v57 = vadd.f32 %v980_v55, %v924_v12 }
 0x455   :  { %v1000_v58 = vsub.f32 %v2119_v2, %v992_v57 }
 0x457   :  { %1008 = vst [vmem:[%s2188_s7 + $0x18] sm:$0xff] %v1000_v58 }
 0x458   :  { %v1232_v59 = vpop.eup %1231 }
 0x459   :  { %v982_v60 = vmul.f32 0.6931472, %v1232_v59  ;;  %v970_v61 = vpop.xlane.xlu1 %969  ;;  %v960_v62 = vpop.xlane.xlu2 %959 }
 0x45a   :  { %1233 = vlog2.f32 %v970_v61 }
 0x45b   :  { %v993_v63 = vadd.f32 %v982_v60, %v926_v17  ;;  %1235 = vlog2.f32 %v960_v62 }
 0x45d   :  { %v1001_v0 = vsub.f32 %v2123_v4, %v993_v63 }
 0x45f   :  { %1009 = vst [vmem:[%s2188_s7 + $0x20] sm:$0xff] %v1001_v0 }
 0x460   :  { %v1234_v3 = vpop.eup %1233 }
 0x461   :  { %v1236_v5 = vpop.eup %1235  ;;  %v986_v2 = vmul.f32 0.6931472, %v1234_v3  ;;  %v968_v7 = vpop.xlane.xlu0 %967 }
 0x462   :  { %v976_v13 = vmul.f32 0.6931472, %v1236_v5  ;;  %1237 = vlog2.f32 %v968_v7 }
 0x463   :  { %v995_v15 = vadd.f32 %v986_v2, %v930_v29 }
 0x464   :  { %v990_v16 = vadd.f32 %v976_v13, %v2137_v19 }
 0x465   :  { %v1003_v9 = vsub.f32 %v2126_v6, %v995_v15 }
 0x466   :  { %v998_v18 = vsub.f32 %v2117_v1, %v990_v16 }
 0x467   :  { %1011 = vst [vmem:[%s2188_s7 + $0x30] sm:$0xff] %v1003_v9 }
 0x468   :  { %v1238_v4 = vpop.eup %1237  ;;  %1006 = vst [vmem:[%s2188_s7 + $0x8] sm:$0xff] %v998_v18 }
 0x469   :  { %v984_v10 = vmul.f32 0.6931472, %v1238_v4  ;;  %v972_v11 = vpop.xlane.xlu2 %971 }
 0x46a   :  { %1239 = vlog2.f32 %v972_v11 }
 0x46b   :  { %v994_v12 = vadd.f32 %v984_v10, %v2144_v33 }
 0x46d   :  { %v1002_v19 = vsub.f32 %v2129_v8, %v994_v12 }
 0x46f   :  { %1010 = vst [vmem:[%s2188_s7 + $0x28] sm:$0xff] %v1002_v19 }
 0x470   :  { %v1240_v1 = vpop.eup %1239 }
 0x471   :  { %v988_v6 = vmul.f32 0.6931472, %v1240_v1 }
 0x473   :  { %v996_v20 = vadd.f32 %v988_v6, %v932_v38 }
 0x475   :  { %v1004_v21 = vsub.f32 %v2132_v14, %v996_v20 }
 0x477   :  { %1012 = vst [vmem:[%s2188_s7 + $0x38] sm:$0xff] %v1004_v21 }

</bundles_post_ra>
